<compile_context>
chip_gen: v6e
topology: v6e:2x2x1
jax: 0.10.0
libtpu: 0.0.40
codegen_flags: <defaults>
</compile_context>

<pallas_src>
import functools

import jax
import jax.numpy as jnp
from jax.experimental import pallas as pl
from jax.experimental.pallas import tpu as pltpu

# Gate order along the packed 4*hidden axis: sigmoid gates first (contiguous
# 3*hidden lane span), tanh (cell update) last.
GATES = ("forget", "input", "output", "cell_update")


# ---------------------------------------------------------------------------
# Fused kernel: per grid step (one block of t_blk time steps)
#   - one big input-projection matmul over t_blk*batch rows (not serial)
#   - t_blk sequential cell updates with only h @ W_hid on the serial path
# ---------------------------------------------------------------------------
def _lstm_kernel(x_ref, w_in_ref, w_hid_ref, b_ref,
                 out_ref, h_last_ref, c_last_ref,
                 gx_scr, h_scr, c_scr, *, t_blk, batch, hidden):
    @pl.when(pl.program_id(0) == 0)
    def _init():
        # state=None in the PyTorch module -> zero-initialized (h, c).
        h_scr[...] = jnp.zeros_like(h_scr)
        c_scr[...] = jnp.zeros_like(c_scr)

    # Hoisted input projection for the whole time block: one MXU matmul over
    # M = t_blk*batch rows (bf16 operands, f32 accumulation), staged in VMEM
    # so the unrolled serial loop below only keeps small tiles live in vregs.
    gx_scr[...] = (
        jnp.dot(x_ref[...].astype(jnp.bfloat16), w_in_ref[...],
                preferred_element_type=jnp.float32)
        + b_ref[...]
    )

    h = h_scr[...]
    c = c_scr[...]
    for t in range(t_blk):  # static unroll; only h @ W_hid is serial
        gates = gx_scr[t * batch:(t + 1) * batch, :] + jnp.dot(
            h.astype(jnp.bfloat16), w_hid_ref[...],
            preferred_element_type=jnp.float32)
        # One wide sigmoid over [forget | input | output], one tanh on the
        # cell-update slice (all lane-aligned: hidden % 128 == 0).
        s = jax.nn.sigmoid(gates[:, :3 * hidden])
        f = s[:, 0 * hidden:1 * hidden]
        i = s[:, 1 * hidden:2 * hidden]
        o = s[:, 2 * hidden:3 * hidden]
        g = jnp.tanh(gates[:, 3 * hidden:4 * hidden])
        c = c * f + i * g
        h = o * jnp.tanh(c)
        out_ref[t * batch:(t + 1) * batch, :] = h.astype(out_ref.dtype)

    # Persist the carry for the next time block.
    h_scr[...] = h
    c_scr[...] = c

    # Final state is only needed once, at the end of the sequence.
    @pl.when(pl.program_id(0) == pl.num_programs(0) - 1)
    def _finalize():
        h_last_ref[0] = h.astype(h_last_ref.dtype)
        c_last_ref[0] = c.astype(c_last_ref.dtype)


def lstm_forward(x, w_in, w_hid, bias, *, t_blk=8):
    """x: (seq, batch, input). Returns (outputs, (h_last, c_last))."""
    seq_len, batch, input_size = x.shape
    hidden = w_hid.shape[0]
    assert seq_len % t_blk == 0, "seq_len must be a multiple of t_blk"
    assert batch % 8 == 0, "batch must be a multiple of the f32 sublane tile"
    assert hidden % 128 == 0, "hidden must be lane-aligned (multiple of 128)"

    rows = t_blk * batch            # rows per time block (sublane-aligned)
    n_tblk = seq_len // t_blk
    x2d = x.reshape(seq_len * batch, input_size)

    kernel = functools.partial(
        _lstm_kernel, t_blk=t_blk, batch=batch, hidden=hidden)

    out2d, h_last, c_last = pl.pallas_call(
        kernel,
        out_shape=(
            jax.ShapeDtypeStruct((seq_len * batch, hidden), x.dtype),
            jax.ShapeDtypeStruct((1, batch, hidden), x.dtype),
            jax.ShapeDtypeStruct((1, batch, hidden), x.dtype),
        ),
        grid_spec=pltpu.PrefetchScalarGridSpec(
            num_scalar_prefetch=0,
            grid=(n_tblk,),
            in_specs=[
                # x block for this group of t_blk time steps.
                pl.BlockSpec((rows, input_size), lambda ti: (ti, 0)),
                # Loop-invariant weights/bias: constant index_map -> DMA'd
                # once in the pipeline prologue and kept VMEM-resident.
                pl.BlockSpec((input_size, 4 * hidden), lambda ti: (0, 0)),
                pl.BlockSpec((hidden, 4 * hidden), lambda ti: (0, 0)),
                pl.BlockSpec((1, 4 * hidden), lambda ti: (0, 0)),
            ],
            out_specs=[
                pl.BlockSpec((rows, hidden), lambda ti: (ti, 0)),
                pl.BlockSpec((1, batch, hidden), lambda ti: (0, 0, 0)),
                pl.BlockSpec((1, batch, hidden), lambda ti: (0, 0, 0)),
            ],
            scratch_shapes=[
                pltpu.VMEM((rows, 4 * hidden), jnp.float32),   # staged gates_x
                pltpu.VMEM((batch, hidden), jnp.float32),      # h carry (f32)
                pltpu.VMEM((batch, hidden), jnp.float32),      # c carry (f32)
            ],
        ),
        compiler_params=pltpu.CompilerParams(
            # Time is a recurrence -> single "arbitrary" grid axis.
            dimension_semantics=("arbitrary",),
        ),
    )(x2d, w_in, w_hid, bias)

    return out2d.reshape(seq_len, batch, hidden), (h_last, c_last)


# ---------------------------------------------------------------------------
# Parameter packing (PyTorch per-gate layout -> batch-major packed weights)
# and a pure-JAX f32 reference that mirrors the PyTorch cell math exactly.
# ---------------------------------------------------------------------------
def pack_lstm_params(params, weight_dtype=jnp.bfloat16):
    """PyTorch cell: gate = act(W_in @ x^T + W_hid @ h^T + b); in batch-major
    form gate = x @ W_in^T + h @ W_hid^T + b^T. Weights go to bf16 for the
    MXU; bias stays f32 (added to the f32 accumulator)."""
    w_in = jnp.concatenate(
        [params[f"{g}_input"].T for g in GATES], axis=1).astype(weight_dtype)
    w_hid = jnp.concatenate(
        [params[f"{g}_hidden"].T for g in GATES], axis=1).astype(weight_dtype)
    bias = jnp.concatenate(
        [params[f"{g}_bias"].T for g in GATES], axis=1).astype(jnp.float32)
    return w_in, w_hid, bias


def lstm_reference(x, params):
    """Pure-JAX f32 reference matching the PyTorch LSTMCell math."""
    batch = x.shape[1]
    hidden = params["forget_hidden"].shape[0]

    def gate(name, x_t, h):
        return (x_t @ params[f"{name}_input"].T
                + h @ params[f"{name}_hidden"].T
                + params[f"{name}_bias"].T)

    def step(carry, x_t):
        h, c = carry
        f = jax.nn.sigmoid(gate("forget", x_t, h))
        i = jax.nn.sigmoid(gate("input", x_t, h))
        g = jnp.tanh(gate("cell_update", x_t, h))
        o = jax.nn.sigmoid(gate("output", x_t, h))
        c_new = c * f + i * g
        h_new = o * jnp.tanh(c_new)
        return (h_new, c_new), h_new

    init = (jnp.zeros((batch, hidden), jnp.float32),
            jnp.zeros((batch, hidden), jnp.float32))
    (h_last, c_last), outs = jax.lax.scan(step, init, x)
    return outs, (h_last[None], c_last[None])


if __name__ == "__main__":
    # Small tile-friendly shapes: hidden multiple of 128 (lane-aligned gate
    # slices), batch multiple of 8 (f32 sublane tile), seq blocked by t_blk=8.
    seq_len, batch, input_size, hidden = 16, 8, 16, 128

    key = jax.random.PRNGKey(0)
    keys = jax.random.split(key, 1 + 2 * len(GATES))
    x = jax.random.normal(keys[0], (seq_len, batch, input_size),
                          dtype=jnp.float32)

    # Per-gate parameters in the PyTorch module's shapes / init ranges:
    #   weights ~ U(-0.2, 0.2), biases = 0.
    params = {}
    ki = 1
    for g in GATES:
        params[f"{g}_hidden"] = jax.random.uniform(
            keys[ki], (hidden, hidden), minval=-0.2, maxval=0.2,
            dtype=jnp.float32); ki += 1
        params[f"{g}_input"] = jax.random.uniform(
            keys[ki], (hidden, input_size), minval=-0.2, maxval=0.2,
            dtype=jnp.float32); ki += 1
        params[f"{g}_bias"] = jnp.zeros((hidden, 1), dtype=jnp.float32)

    w_in, w_hid, bias = pack_lstm_params(params)

    outputs, (h_last, c_last) = lstm_forward(x, w_in, w_hid, bias, t_blk=8)
    jax.block_until_ready((outputs, h_last, c_last))

    ref_out, (ref_h, ref_c) = lstm_reference(x, params)
    assert outputs.shape == (seq_len, batch, hidden)
    assert h_last.shape == (1, batch, hidden)
    assert c_last.shape == (1, batch, hidden)
    # bf16 weights on the MXU (f32 accumulation) vs. the pure-f32 reference:
    # allow a modestly looser tolerance.
    out_err = float(jnp.max(jnp.abs(outputs - ref_out)))
    h_err = float(jnp.max(jnp.abs(h_last - ref_h)))
    c_err = float(jnp.max(jnp.abs(c_last - ref_c)))
    assert out_err < 3e-2, out_err
    assert h_err < 3e-2, h_err
    assert c_err < 3e-2, c_err

    print("KERNEL_OK")
</pallas_src>

<mosaic_0001>
module attributes {stable_mosaic.version = 11 : i64} {
  func.func @_lstm_kernel(%arg0: i32, %arg1: memref<64x16xf32, #tpu.memory_space<vmem>>, %arg2: memref<16x512xbf16, #tpu.memory_space<vmem>>, %arg3: memref<128x512xbf16, #tpu.memory_space<vmem>>, %arg4: memref<1x512xf32, #tpu.memory_space<vmem>>, %arg5: memref<64x128xf32, #tpu.memory_space<vmem>>, %arg6: memref<1x8x128xf32, #tpu.memory_space<vmem>>, %arg7: memref<1x8x128xf32, #tpu.memory_space<vmem>>, %arg8: memref<64x512xf32, #tpu.memory_space<vmem>>, %arg9: memref<8x128xf32, #tpu.memory_space<vmem>>, %arg10: memref<8x128xf32, #tpu.memory_space<vmem>>) attributes {dimension_semantics = [#tpu.dimension_semantics<arbitrary>], iteration_bounds = array<i64: 2>, scalar_prefetch = 0 : i64, scratch_operands = 3 : i64, tpu.core_type = #tpu.core_type<tc>, window_params = [{transform_indices = @transform_0, window_bounds = array<i64: 64, 16>}, {pipeline_mode = #tpu.pipeline_mode<synchronous>, transform_indices = @transform_1, window_bounds = array<i64: 16, 512>}, {pipeline_mode = #tpu.pipeline_mode<synchronous>, transform_indices = @transform_2, window_bounds = array<i64: 128, 512>}, {pipeline_mode = #tpu.pipeline_mode<synchronous>, transform_indices = @transform_3, window_bounds = array<i64: 1, 512>}, {transform_indices = @transform_4, window_bounds = array<i64: 64, 128>}, {pipeline_mode = #tpu.pipeline_mode<synchronous>, transform_indices = @transform_5, window_bounds = array<i64: 1, 8, 128>}, {pipeline_mode = #tpu.pipeline_mode<synchronous>, transform_indices = @transform_6, window_bounds = array<i64: 1, 8, 128>}]} {
    %c0_i32 = arith.constant 0 : i32
    %0 = arith.cmpi eq, %arg0, %c0_i32 : i32
    %1 = arith.extui %0 : i1 to i32
    %c0_i32_0 = arith.constant 0 : i32
    %2 = arith.cmpi ne, %1, %c0_i32_0 : i32
    scf.if %2 {
      %cst_74 = arith.constant 0.000000e+00 : f32
      %194 = vector.broadcast %cst_74 : f32 to vector<8x128xf32>
      %c0_75 = arith.constant 0 : index
      %c0_76 = arith.constant 0 : index
      %195 = vector.load %arg9[%c0_75, %c0_76] : memref<8x128xf32, #tpu.memory_space<vmem>>, vector<8x128xf32>
      tpu.vector_store %arg9[%c0_75, %c0_76], %194 {strides = array<i32>} : memref<8x128xf32, #tpu.memory_space<vmem>>, vector<8x128xf32>,
      %cst_77 = arith.constant 0.000000e+00 : f32
      %196 = vector.broadcast %cst_77 : f32 to vector<8x128xf32>
      %c0_78 = arith.constant 0 : index
      %c0_79 = arith.constant 0 : index
      %197 = vector.load %arg10[%c0_78, %c0_79] : memref<8x128xf32, #tpu.memory_space<vmem>>, vector<8x128xf32>
      tpu.vector_store %arg10[%c0_78, %c0_79], %196 {strides = array<i32>} : memref<8x128xf32, #tpu.memory_space<vmem>>, vector<8x128xf32>,
    } else {
    }
    %c0 = arith.constant 0 : index
    %c0_1 = arith.constant 0 : index
    %3 = vector.load %arg1[%c0, %c0_1] : memref<64x16xf32, #tpu.memory_space<vmem>>, vector<64x16xf32>
    %4 = arith.truncf %3 : vector<64x16xf32> to vector<64x16xbf16>
    %c0_2 = arith.constant 0 : index
    %c0_3 = arith.constant 0 : index
    %5 = vector.load %arg2[%c0_2, %c0_3] : memref<16x512xbf16, #tpu.memory_space<vmem>>, vector<16x512xbf16>
    %cst = arith.constant dense<0.000000e+00> : vector<64x512xf32>
    %6 = tpu.matmul %4, %5, %cst {dimension_numbers = #tpu.dot_dimension_numbers<[1], [0], [0], [1], [0, 0, 1, 1], [], []>} : vector<64x16xbf16>, vector<16x512xbf16>, vector<64x512xf32> -> vector<64x512xf32>
    %c0_4 = arith.constant 0 : index
    %c0_5 = arith.constant 0 : index
    %7 = vector.load %arg4[%c0_4, %c0_5] : memref<1x512xf32, #tpu.memory_space<vmem>>, vector<1x512xf32>
    %8 = vector.broadcast %7 : vector<1x512xf32> to vector<64x512xf32>
    %9 = arith.addf %6, %8 : vector<64x512xf32>
    %c0_6 = arith.constant 0 : index
    %c0_7 = arith.constant 0 : index
    %10 = vector.load %arg8[%c0_6, %c0_7] : memref<64x512xf32, #tpu.memory_space<vmem>>, vector<64x512xf32>
    tpu.vector_store %arg8[%c0_6, %c0_7], %9 {strides = array<i32>} : memref<64x512xf32, #tpu.memory_space<vmem>>, vector<64x512xf32>,
    %c0_8 = arith.constant 0 : index
    %c0_9 = arith.constant 0 : index
    %11 = vector.load %arg9[%c0_8, %c0_9] : memref<8x128xf32, #tpu.memory_space<vmem>>, vector<8x128xf32>
    %c0_10 = arith.constant 0 : index
    %c0_11 = arith.constant 0 : index
    %12 = vector.load %arg10[%c0_10, %c0_11] : memref<8x128xf32, #tpu.memory_space<vmem>>, vector<8x128xf32>
    %c0_12 = arith.constant 0 : index
    %c0_13 = arith.constant 0 : index
    %13 = vector.load %arg8[%c0_12, %c0_13] : memref<64x512xf32, #tpu.memory_space<vmem>>, vector<8x512xf32>
    %14 = arith.truncf %11 : vector<8x128xf32> to vector<8x128xbf16>
    %c0_14 = arith.constant 0 : index
    %c0_15 = arith.constant 0 : index
    %15 = vector.load %arg3[%c0_14, %c0_15] : memref<128x512xbf16, #tpu.memory_space<vmem>>, vector<128x512xbf16>
    %cst_16 = arith.constant dense<0.000000e+00> : vector<8x512xf32>
    %16 = tpu.matmul %14, %15, %cst_16 {dimension_numbers = #tpu.dot_dimension_numbers<[1], [0], [0], [1], [0, 0, 1, 1], [], []>} : vector<8x128xbf16>, vector<128x512xbf16>, vector<8x512xf32> -> vector<8x512xf32>
    %17 = arith.addf %13, %16 : vector<8x512xf32>
    %18 = vector.extract_strided_slice %17 {offsets = [0, 0], sizes = [8, 384], strides = [1, 1]} : vector<8x512xf32> to vector<8x384xf32>
    %19 = arith.negf %18 : vector<8x384xf32>
    %20 = math.exp %19 : vector<8x384xf32>
    %cst_17 = arith.constant 1.000000e+00 : f32
    %21 = vector.broadcast %cst_17 : f32 to vector<8x384xf32>
    %22 = arith.addf %21, %20 : vector<8x384xf32>
    %23 = arith.divf %21, %22 : vector<8x384xf32>
    %24 = vector.extract_strided_slice %23 {offsets = [0, 0], sizes = [8, 128], strides = [1, 1]} : vector<8x384xf32> to vector<8x128xf32>
    %25 = vector.extract_strided_slice %23 {offsets = [0, 128], sizes = [8, 128], strides = [1, 1]} : vector<8x384xf32> to vector<8x128xf32>
    %26 = vector.extract_strided_slice %23 {offsets = [0, 256], sizes = [8, 128], strides = [1, 1]} : vector<8x384xf32> to vector<8x128xf32>
    %27 = vector.extract_strided_slice %17 {offsets = [0, 384], sizes = [8, 128], strides = [1, 1]} : vector<8x512xf32> to vector<8x128xf32>
    %28 = math.tanh %27 : vector<8x128xf32>
    %29 = arith.mulf %12, %24 : vector<8x128xf32>
    %30 = arith.mulf %25, %28 : vector<8x128xf32>
    %31 = arith.addf %29, %30 : vector<8x128xf32>
    %32 = math.tanh %31 : vector<8x128xf32>
    %33 = arith.mulf %26, %32 : vector<8x128xf32>
    %c0_18 = arith.constant 0 : index
    %c0_19 = arith.constant 0 : index
    %34 = vector.load %arg5[%c0_18, %c0_19] : memref<64x128xf32, #tpu.memory_space<vmem>>, vector<8x128xf32>
    tpu.vector_store %arg5[%c0_18, %c0_19], %33 {strides = array<i32>} : memref<64x128xf32, #tpu.memory_space<vmem>>, vector<8x128xf32>,
    %c8 = arith.constant 8 : index
    %c0_20 = arith.constant 0 : index
    %35 = vector.load %arg8[%c8, %c0_20] : memref<64x512xf32, #tpu.memory_space<vmem>>, vector<8x512xf32>
    %36 = arith.truncf %33 : vector<8x128xf32> to vector<8x128xbf16>
    %c0_21 = arith.constant 0 : index
    %c0_22 = arith.constant 0 : index
    %37 = vector.load %arg3[%c0_21, %c0_22] : memref<128x512xbf16, #tpu.memory_space<vmem>>, vector<128x512xbf16>
    %cst_23 = arith.constant dense<0.000000e+00> : vector<8x512xf32>
    %38 = tpu.matmul %36, %37, %cst_23 {dimension_numbers = #tpu.dot_dimension_numbers<[1], [0], [0], [1], [0, 0, 1, 1], [], []>} : vector<8x128xbf16>, vector<128x512xbf16>, vector<8x512xf32> -> vector<8x512xf32>
    %39 = arith.addf %35, %38 : vector<8x512xf32>
    %40 = vector.extract_strided_slice %39 {offsets = [0, 0], sizes = [8, 384], strides = [1, 1]} : vector<8x512xf32> to vector<8x384xf32>
    %41 = arith.negf %40 : vector<8x384xf32>
    %42 = math.exp %41 : vector<8x384xf32>
    %cst_24 = arith.constant 1.000000e+00 : f32
    %43 = vector.broadcast %cst_24 : f32 to vector<8x384xf32>
    %44 = arith.addf %43, %42 : vector<8x384xf32>
    %45 = arith.divf %43, %44 : vector<8x384xf32>
    %46 = vector.extract_strided_slice %45 {offsets = [0, 0], sizes = [8, 128], strides = [1, 1]} : vector<8x384xf32> to vector<8x128xf32>
    %47 = vector.extract_strided_slice %45 {offsets = [0, 128], sizes = [8, 128], strides = [1, 1]} : vector<8x384xf32> to vector<8x128xf32>
    %48 = vector.extract_strided_slice %45 {offsets = [0, 256], sizes = [8, 128], strides = [1, 1]} : vector<8x384xf32> to vector<8x128xf32>
    %49 = vector.extract_strided_slice %39 {offsets = [0, 384], sizes = [8, 128], strides = [1, 1]} : vector<8x512xf32> to vector<8x128xf32>
    %50 = math.tanh %49 : vector<8x128xf32>
    %51 = arith.mulf %31, %46 : vector<8x128xf32>
    %52 = arith.mulf %47, %50 : vector<8x128xf32>
    %53 = arith.addf %51, %52 : vector<8x128xf32>
    %54 = math.tanh %53 : vector<8x128xf32>
    %55 = arith.mulf %48, %54 : vector<8x128xf32>
    %c8_25 = arith.constant 8 : index
    %c0_26 = arith.constant 0 : index
    %56 = vector.load %arg5[%c8_25, %c0_26] : memref<64x128xf32, #tpu.memory_space<vmem>>, vector<8x128xf32>
    tpu.vector_store %arg5[%c8_25, %c0_26], %55 {strides = array<i32>} : memref<64x128xf32, #tpu.memory_space<vmem>>, vector<8x128xf32>,
    %c16 = arith.constant 16 : index
    %c0_27 = arith.constant 0 : index
    %57 = vector.load %arg8[%c16, %c0_27] : memref<64x512xf32, #tpu.memory_space<vmem>>, vector<8x512xf32>
    %58 = arith.truncf %55 : vector<8x128xf32> to vector<8x128xbf16>
    %c0_28 = arith.constant 0 : index
    %c0_29 = arith.constant 0 : index
    %59 = vector.load %arg3[%c0_28, %c0_29] : memref<128x512xbf16, #tpu.memory_space<vmem>>, vector<128x512xbf16>
    %cst_30 = arith.constant dense<0.000000e+00> : vector<8x512xf32>
    %60 = tpu.matmul %58, %59, %cst_30 {dimension_numbers = #tpu.dot_dimension_numbers<[1], [0], [0], [1], [0, 0, 1, 1], [], []>} : vector<8x128xbf16>, vector<128x512xbf16>, vector<8x512xf32> -> vector<8x512xf32>
    %61 = arith.addf %57, %60 : vector<8x512xf32>
    %62 = vector.extract_strided_slice %61 {offsets = [0, 0], sizes = [8, 384], strides = [1, 1]} : vector<8x512xf32> to vector<8x384xf32>
    %63 = arith.negf %62 : vector<8x384xf32>
    %64 = math.exp %63 : vector<8x384xf32>
    %cst_31 = arith.constant 1.000000e+00 : f32
    %65 = vector.broadcast %cst_31 : f32 to vector<8x384xf32>
    %66 = arith.addf %65, %64 : vector<8x384xf32>
    %67 = arith.divf %65, %66 : vector<8x384xf32>
    %68 = vector.extract_strided_slice %67 {offsets = [0, 0], sizes = [8, 128], strides = [1, 1]} : vector<8x384xf32> to vector<8x128xf32>
    %69 = vector.extract_strided_slice %67 {offsets = [0, 128], sizes = [8, 128], strides = [1, 1]} : vector<8x384xf32> to vector<8x128xf32>
    %70 = vector.extract_strided_slice %67 {offsets = [0, 256], sizes = [8, 128], strides = [1, 1]} : vector<8x384xf32> to vector<8x128xf32>
    %71 = vector.extract_strided_slice %61 {offsets = [0, 384], sizes = [8, 128], strides = [1, 1]} : vector<8x512xf32> to vector<8x128xf32>
    %72 = math.tanh %71 : vector<8x128xf32>
    %73 = arith.mulf %53, %68 : vector<8x128xf32>
    %74 = arith.mulf %69, %72 : vector<8x128xf32>
    %75 = arith.addf %73, %74 : vector<8x128xf32>
    %76 = math.tanh %75 : vector<8x128xf32>
    %77 = arith.mulf %70, %76 : vector<8x128xf32>
    %c16_32 = arith.constant 16 : index
    %c0_33 = arith.constant 0 : index
    %78 = vector.load %arg5[%c16_32, %c0_33] : memref<64x128xf32, #tpu.memory_space<vmem>>, vector<8x128xf32>
    tpu.vector_store %arg5[%c16_32, %c0_33], %77 {strides = array<i32>} : memref<64x128xf32, #tpu.memory_space<vmem>>, vector<8x128xf32>,
    %c24 = arith.constant 24 : index
    %c0_34 = arith.constant 0 : index
    %79 = vector.load %arg8[%c24, %c0_34] : memref<64x512xf32, #tpu.memory_space<vmem>>, vector<8x512xf32>
    %80 = arith.truncf %77 : vector<8x128xf32> to vector<8x128xbf16>
    %c0_35 = arith.constant 0 : index
    %c0_36 = arith.constant 0 : index
    %81 = vector.load %arg3[%c0_35, %c0_36] : memref<128x512xbf16, #tpu.memory_space<vmem>>, vector<128x512xbf16>
    %cst_37 = arith.constant dense<0.000000e+00> : vector<8x512xf32>
    %82 = tpu.matmul %80, %81, %cst_37 {dimension_numbers = #tpu.dot_dimension_numbers<[1], [0], [0], [1], [0, 0, 1, 1], [], []>} : vector<8x128xbf16>, vector<128x512xbf16>, vector<8x512xf32> -> vector<8x512xf32>
    %83 = arith.addf %79, %82 : vector<8x512xf32>
    %84 = vector.extract_strided_slice %83 {offsets = [0, 0], sizes = [8, 384], strides = [1, 1]} : vector<8x512xf32> to vector<8x384xf32>
    %85 = arith.negf %84 : vector<8x384xf32>
    %86 = math.exp %85 : vector<8x384xf32>
    %cst_38 = arith.constant 1.000000e+00 : f32
    %87 = vector.broadcast %cst_38 : f32 to vector<8x384xf32>
    %88 = arith.addf %87, %86 : vector<8x384xf32>
    %89 = arith.divf %87, %88 : vector<8x384xf32>
    %90 = vector.extract_strided_slice %89 {offsets = [0, 0], sizes = [8, 128], strides = [1, 1]} : vector<8x384xf32> to vector<8x128xf32>
    %91 = vector.extract_strided_slice %89 {offsets = [0, 128], sizes = [8, 128], strides = [1, 1]} : vector<8x384xf32> to vector<8x128xf32>
    %92 = vector.extract_strided_slice %89 {offsets = [0, 256], sizes = [8, 128], strides = [1, 1]} : vector<8x384xf32> to vector<8x128xf32>
    %93 = vector.extract_strided_slice %83 {offsets = [0, 384], sizes = [8, 128], strides = [1, 1]} : vector<8x512xf32> to vector<8x128xf32>
    %94 = math.tanh %93 : vector<8x128xf32>
    %95 = arith.mulf %75, %90 : vector<8x128xf32>
    %96 = arith.mulf %91, %94 : vector<8x128xf32>
    %97 = arith.addf %95, %96 : vector<8x128xf32>
    %98 = math.tanh %97 : vector<8x128xf32>
    %99 = arith.mulf %92, %98 : vector<8x128xf32>
    %c24_39 = arith.constant 24 : index
    %c0_40 = arith.constant 0 : index
    %100 = vector.load %arg5[%c24_39, %c0_40] : memref<64x128xf32, #tpu.memory_space<vmem>>, vector<8x128xf32>
    tpu.vector_store %arg5[%c24_39, %c0_40], %99 {strides = array<i32>} : memref<64x128xf32, #tpu.memory_space<vmem>>, vector<8x128xf32>,
    %c32 = arith.constant 32 : index
    %c0_41 = arith.constant 0 : index
    %101 = vector.load %arg8[%c32, %c0_41] : memref<64x512xf32, #tpu.memory_space<vmem>>, vector<8x512xf32>
    %102 = arith.truncf %99 : vector<8x128xf32> to vector<8x128xbf16>
    %c0_42 = arith.constant 0 : index
    %c0_43 = arith.constant 0 : index
    %103 = vector.load %arg3[%c0_42, %c0_43] : memref<128x512xbf16, #tpu.memory_space<vmem>>, vector<128x512xbf16>
    %cst_44 = arith.constant dense<0.000000e+00> : vector<8x512xf32>
    %104 = tpu.matmul %102, %103, %cst_44 {dimension_numbers = #tpu.dot_dimension_numbers<[1], [0], [0], [1], [0, 0, 1, 1], [], []>} : vector<8x128xbf16>, vector<128x512xbf16>, vector<8x512xf32> -> vector<8x512xf32>
    %105 = arith.addf %101, %104 : vector<8x512xf32>
    %106 = vector.extract_strided_slice %105 {offsets = [0, 0], sizes = [8, 384], strides = [1, 1]} : vector<8x512xf32> to vector<8x384xf32>
    %107 = arith.negf %106 : vector<8x384xf32>
    %108 = math.exp %107 : vector<8x384xf32>
    %cst_45 = arith.constant 1.000000e+00 : f32
    %109 = vector.broadcast %cst_45 : f32 to vector<8x384xf32>
    %110 = arith.addf %109, %108 : vector<8x384xf32>
    %111 = arith.divf %109, %110 : vector<8x384xf32>
    %112 = vector.extract_strided_slice %111 {offsets = [0, 0], sizes = [8, 128], strides = [1, 1]} : vector<8x384xf32> to vector<8x128xf32>
    %113 = vector.extract_strided_slice %111 {offsets = [0, 128], sizes = [8, 128], strides = [1, 1]} : vector<8x384xf32> to vector<8x128xf32>
    %114 = vector.extract_strided_slice %111 {offsets = [0, 256], sizes = [8, 128], strides = [1, 1]} : vector<8x384xf32> to vector<8x128xf32>
    %115 = vector.extract_strided_slice %105 {offsets = [0, 384], sizes = [8, 128], strides = [1, 1]} : vector<8x512xf32> to vector<8x128xf32>
    %116 = math.tanh %115 : vector<8x128xf32>
    %117 = arith.mulf %97, %112 : vector<8x128xf32>
    %118 = arith.mulf %113, %116 : vector<8x128xf32>
    %119 = arith.addf %117, %118 : vector<8x128xf32>
    %120 = math.tanh %119 : vector<8x128xf32>
    %121 = arith.mulf %114, %120 : vector<8x128xf32>
    %c32_46 = arith.constant 32 : index
    %c0_47 = arith.constant 0 : index
    %122 = vector.load %arg5[%c32_46, %c0_47] : memref<64x128xf32, #tpu.memory_space<vmem>>, vector<8x128xf32>
    tpu.vector_store %arg5[%c32_46, %c0_47], %121 {strides = array<i32>} : memref<64x128xf32, #tpu.memory_space<vmem>>, vector<8x128xf32>,
    %c40 = arith.constant 40 : index
    %c0_48 = arith.constant 0 : index
    %123 = vector.load %arg8[%c40, %c0_48] : memref<64x512xf32, #tpu.memory_space<vmem>>, vector<8x512xf32>
    %124 = arith.truncf %121 : vector<8x128xf32> to vector<8x128xbf16>
    %c0_49 = arith.constant 0 : index
    %c0_50 = arith.constant 0 : index
    %125 = vector.load %arg3[%c0_49, %c0_50] : memref<128x512xbf16, #tpu.memory_space<vmem>>, vector<128x512xbf16>
    %cst_51 = arith.constant dense<0.000000e+00> : vector<8x512xf32>
    %126 = tpu.matmul %124, %125, %cst_51 {dimension_numbers = #tpu.dot_dimension_numbers<[1], [0], [0], [1], [0, 0, 1, 1], [], []>} : vector<8x128xbf16>, vector<128x512xbf16>, vector<8x512xf32> -> vector<8x512xf32>
    %127 = arith.addf %123, %126 : vector<8x512xf32>
    %128 = vector.extract_strided_slice %127 {offsets = [0, 0], sizes = [8, 384], strides = [1, 1]} : vector<8x512xf32> to vector<8x384xf32>
    %129 = arith.negf %128 : vector<8x384xf32>
    %130 = math.exp %129 : vector<8x384xf32>
    %cst_52 = arith.constant 1.000000e+00 : f32
    %131 = vector.broadcast %cst_52 : f32 to vector<8x384xf32>
    %132 = arith.addf %131, %130 : vector<8x384xf32>
    %133 = arith.divf %131, %132 : vector<8x384xf32>
    %134 = vector.extract_strided_slice %133 {offsets = [0, 0], sizes = [8, 128], strides = [1, 1]} : vector<8x384xf32> to vector<8x128xf32>
    %135 = vector.extract_strided_slice %133 {offsets = [0, 128], sizes = [8, 128], strides = [1, 1]} : vector<8x384xf32> to vector<8x128xf32>
    %136 = vector.extract_strided_slice %133 {offsets = [0, 256], sizes = [8, 128], strides = [1, 1]} : vector<8x384xf32> to vector<8x128xf32>
    %137 = vector.extract_strided_slice %127 {offsets = [0, 384], sizes = [8, 128], strides = [1, 1]} : vector<8x512xf32> to vector<8x128xf32>
    %138 = math.tanh %137 : vector<8x128xf32>
    %139 = arith.mulf %119, %134 : vector<8x128xf32>
    %140 = arith.mulf %135, %138 : vector<8x128xf32>
    %141 = arith.addf %139, %140 : vector<8x128xf32>
    %142 = math.tanh %141 : vector<8x128xf32>
    %143 = arith.mulf %136, %142 : vector<8x128xf32>
    %c40_53 = arith.constant 40 : index
    %c0_54 = arith.constant 0 : index
    %144 = vector.load %arg5[%c40_53, %c0_54] : memref<64x128xf32, #tpu.memory_space<vmem>>, vector<8x128xf32>
    tpu.vector_store %arg5[%c40_53, %c0_54], %143 {strides = array<i32>} : memref<64x128xf32, #tpu.memory_space<vmem>>, vector<8x128xf32>,
    %c48 = arith.constant 48 : index
    %c0_55 = arith.constant 0 : index
    %145 = vector.load %arg8[%c48, %c0_55] : memref<64x512xf32, #tpu.memory_space<vmem>>, vector<8x512xf32>
    %146 = arith.truncf %143 : vector<8x128xf32> to vector<8x128xbf16>
    %c0_56 = arith.constant 0 : index
    %c0_57 = arith.constant 0 : index
    %147 = vector.load %arg3[%c0_56, %c0_57] : memref<128x512xbf16, #tpu.memory_space<vmem>>, vector<128x512xbf16>
    %cst_58 = arith.constant dense<0.000000e+00> : vector<8x512xf32>
    %148 = tpu.matmul %146, %147, %cst_58 {dimension_numbers = #tpu.dot_dimension_numbers<[1], [0], [0], [1], [0, 0, 1, 1], [], []>} : vector<8x128xbf16>, vector<128x512xbf16>, vector<8x512xf32> -> vector<8x512xf32>
    %149 = arith.addf %145, %148 : vector<8x512xf32>
    %150 = vector.extract_strided_slice %149 {offsets = [0, 0], sizes = [8, 384], strides = [1, 1]} : vector<8x512xf32> to vector<8x384xf32>
    %151 = arith.negf %150 : vector<8x384xf32>
    %152 = math.exp %151 : vector<8x384xf32>
    %cst_59 = arith.constant 1.000000e+00 : f32
    %153 = vector.broadcast %cst_59 : f32 to vector<8x384xf32>
    %154 = arith.addf %153, %152 : vector<8x384xf32>
    %155 = arith.divf %153, %154 : vector<8x384xf32>
    %156 = vector.extract_strided_slice %155 {offsets = [0, 0], sizes = [8, 128], strides = [1, 1]} : vector<8x384xf32> to vector<8x128xf32>
    %157 = vector.extract_strided_slice %155 {offsets = [0, 128], sizes = [8, 128], strides = [1, 1]} : vector<8x384xf32> to vector<8x128xf32>
    %158 = vector.extract_strided_slice %155 {offsets = [0, 256], sizes = [8, 128], strides = [1, 1]} : vector<8x384xf32> to vector<8x128xf32>
    %159 = vector.extract_strided_slice %149 {offsets = [0, 384], sizes = [8, 128], strides = [1, 1]} : vector<8x512xf32> to vector<8x128xf32>
    %160 = math.tanh %159 : vector<8x128xf32>
    %161 = arith.mulf %141, %156 : vector<8x128xf32>
    %162 = arith.mulf %157, %160 : vector<8x128xf32>
    %163 = arith.addf %161, %162 : vector<8x128xf32>
    %164 = math.tanh %163 : vector<8x128xf32>
    %165 = arith.mulf %158, %164 : vector<8x128xf32>
    %c48_60 = arith.constant 48 : index
    %c0_61 = arith.constant 0 : index
    %166 = vector.load %arg5[%c48_60, %c0_61] : memref<64x128xf32, #tpu.memory_space<vmem>>, vector<8x128xf32>
    tpu.vector_store %arg5[%c48_60, %c0_61], %165 {strides = array<i32>} : memref<64x128xf32, #tpu.memory_space<vmem>>, vector<8x128xf32>,
    %c56 = arith.constant 56 : index
    %c0_62 = arith.constant 0 : index
    %167 = vector.load %arg8[%c56, %c0_62] : memref<64x512xf32, #tpu.memory_space<vmem>>, vector<8x512xf32>
    %168 = arith.truncf %165 : vector<8x128xf32> to vector<8x128xbf16>
    %c0_63 = arith.constant 0 : index
    %c0_64 = arith.constant 0 : index
    %169 = vector.load %arg3[%c0_63, %c0_64] : memref<128x512xbf16, #tpu.memory_space<vmem>>, vector<128x512xbf16>
    %cst_65 = arith.constant dense<0.000000e+00> : vector<8x512xf32>
    %170 = tpu.matmul %168, %169, %cst_65 {dimension_numbers = #tpu.dot_dimension_numbers<[1], [0], [0], [1], [0, 0, 1, 1], [], []>} : vector<8x128xbf16>, vector<128x512xbf16>, vector<8x512xf32> -> vector<8x512xf32>
    %171 = arith.addf %167, %170 : vector<8x512xf32>
    %172 = vector.extract_strided_slice %171 {offsets = [0, 0], sizes = [8, 384], strides = [1, 1]} : vector<8x512xf32> to vector<8x384xf32>
    %173 = arith.negf %172 : vector<8x384xf32>
    %174 = math.exp %173 : vector<8x384xf32>
    %cst_66 = arith.constant 1.000000e+00 : f32
    %175 = vector.broadcast %cst_66 : f32 to vector<8x384xf32>
    %176 = arith.addf %175, %174 : vector<8x384xf32>
    %177 = arith.divf %175, %176 : vector<8x384xf32>
    %178 = vector.extract_strided_slice %177 {offsets = [0, 0], sizes = [8, 128], strides = [1, 1]} : vector<8x384xf32> to vector<8x128xf32>
    %179 = vector.extract_strided_slice %177 {offsets = [0, 128], sizes = [8, 128], strides = [1, 1]} : vector<8x384xf32> to vector<8x128xf32>
    %180 = vector.extract_strided_slice %177 {offsets = [0, 256], sizes = [8, 128], strides = [1, 1]} : vector<8x384xf32> to vector<8x128xf32>
    %181 = vector.extract_strided_slice %171 {offsets = [0, 384], sizes = [8, 128], strides = [1, 1]} : vector<8x512xf32> to vector<8x128xf32>
    %182 = math.tanh %181 : vector<8x128xf32>
    %183 = arith.mulf %163, %178 : vector<8x128xf32>
    %184 = arith.mulf %179, %182 : vector<8x128xf32>
    %185 = arith.addf %183, %184 : vector<8x128xf32>
    %186 = math.tanh %185 : vector<8x128xf32>
    %187 = arith.mulf %180, %186 : vector<8x128xf32>
    %c56_67 = arith.constant 56 : index
    %c0_68 = arith.constant 0 : index
    %188 = vector.load %arg5[%c56_67, %c0_68] : memref<64x128xf32, #tpu.memory_space<vmem>>, vector<8x128xf32>
    tpu.vector_store %arg5[%c56_67, %c0_68], %187 {strides = array<i32>} : memref<64x128xf32, #tpu.memory_space<vmem>>, vector<8x128xf32>,
    %c0_69 = arith.constant 0 : index
    %c0_70 = arith.constant 0 : index
    %189 = vector.load %arg9[%c0_69, %c0_70] : memref<8x128xf32, #tpu.memory_space<vmem>>, vector<8x128xf32>
    tpu.vector_store %arg9[%c0_69, %c0_70], %187 {strides = array<i32>} : memref<8x128xf32, #tpu.memory_space<vmem>>, vector<8x128xf32>,
    %c0_71 = arith.constant 0 : index
    %c0_72 = arith.constant 0 : index
    %190 = vector.load %arg10[%c0_71, %c0_72] : memref<8x128xf32, #tpu.memory_space<vmem>>, vector<8x128xf32>
    tpu.vector_store %arg10[%c0_71, %c0_72], %185 {strides = array<i32>} : memref<8x128xf32, #tpu.memory_space<vmem>>, vector<8x128xf32>,
    %c1_i32 = arith.constant 1 : i32
    %191 = arith.cmpi eq, %arg0, %c1_i32 : i32
    %192 = arith.extui %191 : i1 to i32
    %c0_i32_73 = arith.constant 0 : i32
    %193 = arith.cmpi ne, %192, %c0_i32_73 : i32
    scf.if %193 {
      %c0_74 = arith.constant 0 : index
      %c0_75 = arith.constant 0 : index
      %c0_76 = arith.constant 0 : index
      %194 = vector.load %arg6[%c0_74, %c0_75, %c0_76] : memref<1x8x128xf32, #tpu.memory_space<vmem>>, vector<1x8x128xf32>
      %195 = vector.shape_cast %194 : vector<1x8x128xf32> to vector<8x128xf32>
      %196 = vector.shape_cast %187 : vector<8x128xf32> to vector<1x8x128xf32>
      tpu.vector_store %arg6[%c0_74, %c0_75, %c0_76], %196 {strides = array<i32>} : memref<1x8x128xf32, #tpu.memory_space<vmem>>, vector<1x8x128xf32>,
      %c0_77 = arith.constant 0 : index
      %c0_78 = arith.constant 0 : index
      %c0_79 = arith.constant 0 : index
      %197 = vector.load %arg7[%c0_77, %c0_78, %c0_79] : memref<1x8x128xf32, #tpu.memory_space<vmem>>, vector<1x8x128xf32>
      %198 = vector.shape_cast %197 : vector<1x8x128xf32> to vector<8x128xf32>
      %199 = vector.shape_cast %185 : vector<8x128xf32> to vector<1x8x128xf32>
      tpu.vector_store %arg7[%c0_77, %c0_78, %c0_79], %199 {strides = array<i32>} : memref<1x8x128xf32, #tpu.memory_space<vmem>>, vector<1x8x128xf32>,
    } else {
    }
    return
  }
  func.func @transform_0(%arg0: i32) -> (i32, i32) {
    %c0_i32 = arith.constant 0 : i32
    %c0_i32_0 = arith.constant 0 : i32
    return %arg0, %c0_i32 : i32, i32
  }
  func.func @transform_1(%arg0: i32) -> (i32, i32) {
    %c0_i32 = arith.constant 0 : i32
    %c0_i32_0 = arith.constant 0 : i32
    %c0_i32_1 = arith.constant 0 : i32
    return %c0_i32, %c0_i32_0 : i32, i32
  }
  func.func @transform_2(%arg0: i32) -> (i32, i32) {
    %c0_i32 = arith.constant 0 : i32
    %c0_i32_0 = arith.constant 0 : i32
    %c0_i32_1 = arith.constant 0 : i32
    return %c0_i32, %c0_i32_0 : i32, i32
  }
  func.func @transform_3(%arg0: i32) -> (i32, i32) {
    %c0_i32 = arith.constant 0 : i32
    %c0_i32_0 = arith.constant 0 : i32
    %c0_i32_1 = arith.constant 0 : i32
    return %c0_i32, %c0_i32_0 : i32, i32
  }
  func.func @transform_4(%arg0: i32) -> (i32, i32) {
    %c0_i32 = arith.constant 0 : i32
    %c0_i32_0 = arith.constant 0 : i32
    return %arg0, %c0_i32 : i32, i32
  }
  func.func @transform_5(%arg0: i32) -> (i32, i32, i32) {
    %c0_i32 = arith.constant 0 : i32
    %c0_i32_0 = arith.constant 0 : i32
    %c0_i32_1 = arith.constant 0 : i32
    %c0_i32_2 = arith.constant 0 : i32
    return %c0_i32, %c0_i32_0, %c0_i32_1 : i32, i32, i32
  }
  func.func @transform_6(%arg0: i32) -> (i32, i32, i32) {
    %c0_i32 = arith.constant 0 : i32
    %c0_i32_0 = arith.constant 0 : i32
    %c0_i32_1 = arith.constant 0 : i32
    %c0_i32_2 = arith.constant 0 : i32
    return %c0_i32, %c0_i32_0, %c0_i32_1 : i32, i32, i32
  }
}

</mosaic_0001>

<bundles_post_ra>
// kernel: tpu_custom_call.1
= control target key start
LH: loop header
LB: loop body
LE: loop exit
PB: predicated region body
PF: predicated region fallthrough
CT: control target
= control target key end

     0   :  { %12 = vsyncpa [#allocation6], 0  ;;  %s4666_s0 = inlined_call_operand.vmem [shape: f32[128,16], index: 0, kind: input, shape index: {}]   ;;  %s4667_s1 = inlined_call_operand.vmem [shape: bf16[16,512], index: 1, kind: input, shape index: {}]   ;;  %s4668_s2 = inlined_call_operand.hbm [shape: bf16[128,512], index: 2, kind: input, shape index: {}]   ;;  %s4669_s3 = inlined_call_operand.vmem [shape: f32[1,512], index: 3, kind: input, shape index: {}]   ;;  %s4670_s4 = inlined_call_operand.hbm [shape: f32[128,128], index: 4, kind: output, shape index: {0}]   ;;  %s4671_s5 = inlined_call_operand.hbm [shape: f32[1,8,128], index: 5, kind: output, shape index: {1}]   ;;  %s4672_s6 = inlined_call_operand.hbm [shape: f32[1,8,128], index: 6, kind: output, shape index: {2}]  }
   0x1   :  { %13 = vsyncpa [#allocation7], 0 }
   0x2   :  { %15 = vsyncpa [#allocation7 + $0x1], 0 }
   0x3   :  { %16 = vsyncpa [#allocation10], 0  ;;  %s3927_s21 = smov 0   ;;  %s3929_s22 = smov 0  }
   0x4   :  { %s3931_s23 = smov 0   ;;  %s3933_s24 = smov 0  }
   0x5 LB: > { %s3948_s25 = sadd.s32 4294967295, %s3880_s24   ;;  %s3125_s26 = sadd.s32 4294967294, %s3880_s24   ;;  %s3880_s24 = sphi %s3933_s24, %s4729_s24   ;;  %s3876_s23 = sphi %s3931_s23, %s4728_s23   ;;  %s3872_s22 = sphi %s3929_s22, %s4727_s22   ;;  %s3868_s21 = sphi %s3927_s21, %s4726_s21  }
   0x6   : > { %s3952_s27 = sadd.s32 1, %s3880_s24   ;;  %s118_s28 = sadd.s32 1, %s3876_s23 }
   0x7   : > { %s115_s29 = ssub.s32 %s3880_s24, %s3952_s27  ;;  %p128_p0 = scmp.ne.s32.totalorder %s3876_s23, %s3872_s22 }
   0x8   : > { %p116_p1 = scmp.eq.s32.totalorder %s115_s29, 0  ;;  %p4673_p2 = scmp.eq.s32.totalorder %s3948_s25, 1 }
   0x9   : > { %p134_p3 = scmp.ne.s32.totalorder %s3872_s22, %s3868_s21  ;;  %p135_p4 = scmp.eq.s32.totalorder %s3125_s26, 1 }
   0xa   : > { %s3963_s30 = scalar_select %p116_p1, %s3876_s23, %s118_s28  }
   0xb   : > { %p3967_p5 = por %p4673_p2, %p128_p0  ;;  %p3971_p6 = por %p135_p4, %p134_p3 }
   0xc   : > { %p3126_p7 = scmp.ge.s32.totalorder %s3880_s24, 1  ;;  %p184_p8 = scmp.lt.s32.totalorder %s3880_s24, 3 }
   0xd   : > { %s4677_s8 = scalar_select %p3971_p6, 1, 0 }
   0xe   : > { %p3460_p10 = scmp.eq.s32.totalorder %s3948_s25, 0  ;;  %p3979_p11 = pnand %p3126_p7, %p184_p8 }
   0xf   : > { %s3882_s10 = smov [#allocation5]  }
  0x10   : > { %s199_s11 = sshll.u32 %s3882_s10, 4  ;;  %p3452_p12 = pneg %p3979_p11  ;;  %s200_s11 = int_to_ptr.vmem [resolvable:$true] %s199_s11 }
  0x11   : > { %s3749_s12 = scalar_lea.vmem %s200_s11, 4096  ;;  %p3757_p2 = scmp.lt.s32.totalorder %s200_s11, %s200_s11 }
  0x12   : > { %p3453_p13 = pnand %p3460_p10, %p3452_p12  ;;  %p3750_p1 = scmp.ne.s32.totalorder %s200_s11, %s3749_s12 }
  0x13   : > { %p3758_p9 = scmp.lt.s32.totalorder %s3749_s12, %s3749_s12 }
  0x14   : > { %p3740_p0 = pneg %p3453_p13 }
  0x15   : > { %p3759_p6 = por %p3758_p9, %p3757_p2 }
  0x16   : > { %p3752_p3 = pnand %p3750_p1, %p3740_p0 }
  0x18   : > { %p3753_p4 = pneg %p3752_p3 }
  0x1a   : > { %p3760_p7 = pnand %p3759_p6, %p3753_p4 }
  0x1c   : > { %3763 = shalt.err (!%p3760_p7)
}
  0x1d   : > { %s3883_s13 = smov 256   ;;  %s3884_s14 = smov 16  }
  0x1e   : > { %3455 = dma.hbm_to_vmem [thread:$0]  (!%p3453_p13), %s4668_s2, 4096, %s200_s11, [#allocation6], %s3883_s13, %s3883_s13, %s3884_s14  }
  0x1f   : > { %227 = sbr.rel (%p3979_p11) target bundleno = 2150 (0x866), region = 36 }
  0x24   : > { %3855 = dma.done.wait (%p3460_p10), [#allocation6], 4096  }
  0x25   : > { %3857 = vsyncadd (%p3460_p10), [#allocation6], 4294963200  ;;  %s250_s17 = sand.u32 1, %s3872_s22   ;;  %s3132_s18 = sshll.u32 %s3948_s25, 3 }
  0x26   : > { %s3131_s19 = sshll.u32 %s250_s17, 6  ;;  %p258_p2 = scmp.lt.s32.totalorder %s3132_s18, 15 }
  0x27   : > { %s4005_s9 = scalar_lea.vmem [#allocation8], %s3131_s19  ;;  %p4679_p6 = scmp.ne.s32.totalorder %s3948_s25, 0 }
  0x28   : > { %s4731_s18 = smov (!%p258_p2, %s3132_s18), 15 }
  0x29   : > { %s3133_s20 = sshll.u32 %s4731_s18, 3  ;;  %268 = sbr.rel (%p4679_p6) target bundleno = 48 (0x30), region = 44 }
  0x2a   : > { %s4003_s29 = scalar_lea.vmem %s4666_s0, %s3133_s20 }
  0x2e   : > { %v3885_v0 = vmov 0.0  }
  0x2f   : > { %269 = vst [vmem:[#allocation3] sm:$0xff] %v3885_v0  ;;  %270 = vst [vmem:[#allocation4] sm:$0xff] %v3885_v0 }
  0x30 PF: > { %v3508_v1 = vld [vmem:[%s4667_s1 + $0x4] ss:$16 sps:$4 sm:$0xff]   ;;  %v3510_v2 = vld [vmem:[%s4667_s1 + $0xc] ss:$16 sps:$4 sm:$0xff]   ;;  %v4674_v3 = vmov 0   ;;  %vm329_vm0 = vcmask 130048   ;;  %v289_v52 = vlaneseq }
  0x31   : > { %374 = vmatprep.mubr.bf16.mxu0 %v4674_v3  ;;  %447 = vmatprep.mubr.bf16.mxu1 %v4674_v3  ;;  %v3512_v4 = vld [vmem:[%s4667_s1] ss:$16 sps:$4 sm:$0xff]   ;;  %v3513_v5 = vld [vmem:[%s4667_s1 + $0x8] ss:$16 sps:$4 sm:$0xff]   ;;  %v4027_v10 = vld [vmem:[#allocation5 + $0xe4] ss:$16 sps:$4 sm:$0xff]  }
  0x32   : > { %356 = vmatprep.subr.bf16.mxu0 %v3508_v1  ;;  %v271_v6 = vld [vmem:[%s4003_s29] sm:$0xff]  ;;  %429 = vmatprep.subr.bf16.mxu1 %v3510_v2  ;;  %v272_v7 = vld [vmem:[%s4003_s29 + $0x8] sm:$0xff]  ;;  %v273_v17 = vld [vmem:[%s4003_s29 + $0x10] sm:$0xff]  ;;  %v290_v53 = vshrl.u32 %v289_v52, 7  ;;  %p3427_p8 = scmp.ne.s32.totalorder %s3948_s25, 1 }
  0x33   : > { %357 = vmatpush1.bf16.msra.mxu0 %v3512_v4  ;;  %430 = vmatpush1.bf16.msra.mxu1 %v3513_v5  ;;  %v279_v8 = vpack.c.bf16 %v272_v7, %v271_v6  ;;  %v4025_v9 = vld [vmem:[#allocation5 + $0xe0] ss:$16 sps:$4 sm:$0xff]   ;;  %v4029_v11 = vld [vmem:[#allocation5 + $0xe8] ss:$16 sps:$4 sm:$0xff]   ;;  %v4031_v12 = vld [vmem:[#allocation5 + $0xec] ss:$16 sps:$4 sm:$0xff]  }
  0x34   : > { %719 = vmatprep.subr.bf16.mxu0 %v4027_v10  ;;  %v4034_v13 = vld [vmem:[#allocation5 + $0xc0] ss:$16 sps:$4 sm:$0xff]   ;;  %v4038_v14 = vld [vmem:[#allocation5 + $0xc4] ss:$16 sps:$4 sm:$0xff]   ;;  %760 = vmatprep.subr.bf16.mxu1 %v4031_v12  ;;  %v4042_v15 = vld [vmem:[#allocation5 + $0xc8] ss:$16 sps:$4 sm:$0xff]  }
  0x35   : > { %v4044_v16 = vld [vmem:[#allocation5 + $0xcc] ss:$16 sps:$4 sm:$0xff]   ;;  %v4052_v19 = vld [vmem:[#allocation5 + $0xa4] ss:$16 sps:$4 sm:$0xff]   ;;  %v4055_v21 = vld [vmem:[#allocation5 + $0xa0] ss:$16 sps:$4 sm:$0xff]  }
  0x36   : > { %3139 = vmatmul.mubr.msk.bf16.vlgmr.msra.gmra.mxu0 %vm329_vm0, %v279_v8  ;;  %3143 = vmatmul.mubr.msk.bf16.vlgmr.msra.gmra.mxu1 %vm329_vm0, %v279_v8  ;;  %v274_v18 = vld [vmem:[%s4003_s29 + $0x18] sm:$0xff]  ;;  %v4064_v24 = vld [vmem:[#allocation5 + $0x84] ss:$16 sps:$4 sm:$0xff]   ;;  %v4071_v26 = vld [vmem:[#allocation5 + $0x80] ss:$16 sps:$4 sm:$0xff]   ;;  %v299_v54 = vsub.s32 2, %v290_v53 }
  0x37   : > { %720 = vmatpush1.bf16.msra.mxu0 %v4025_v9  ;;  %761 = vmatpush1.bf16.msra.mxu1 %v4029_v11  ;;  %v280_v20 = vpack.c.bf16 %v274_v18, %v273_v17  ;;  %v4057_v22 = vld [vmem:[#allocation5 + $0xac] ss:$16 sps:$4 sm:$0xff]   ;;  %v4060_v23 = vld [vmem:[#allocation5 + $0xa8] ss:$16 sps:$4 sm:$0xff]   ;;  %v275_v27 = vld [vmem:[%s4003_s29 + $0x20] sm:$0xff]  ;;  %v291_v55 = vsub.s32 0, %v290_v53 }
  0x38   : > { %721 = vmatprep.subr.bf16.mxu0 %v4038_v14  ;;  %762 = vmatprep.subr.bf16.mxu1 %v4044_v16  ;;  %v4067_v25 = vld [vmem:[#allocation5 + $0x8c] ss:$16 sps:$4 sm:$0xff]   ;;  %v4079_v29 = vld [vmem:[#allocation5 + $0x88] ss:$16 sps:$4 sm:$0xff]   ;;  %v4081_v30 = vld [vmem:[#allocation5 + $0x64] ss:$16 sps:$4 sm:$0xff]  }
  0x39   : > { %384 = vmatprep.mubr.bf16.mxu0 %v4674_v3  ;;  %457 = vmatprep.mubr.bf16.mxu1 %v4674_v3  ;;  %v276_v28 = vld [vmem:[%s4003_s29 + $0x28] sm:$0xff]  ;;  %v4088_v33 = vld [vmem:[#allocation5 + $0x60] ss:$16 sps:$4 sm:$0xff]   ;;  %v4094_v35 = vld [vmem:[#allocation5 + $0x44] ss:$16 sps:$4 sm:$0xff]   ;;  %v303_v56 = vsub.s32 3, %v290_v53 }
  0x3a   : > { %v4085_v31 = vld [vmem:[#allocation5 + $0x6c] ss:$16 sps:$4 sm:$0xff]   ;;  %v281_v32 = vpack.c.bf16 %v276_v28, %v275_v27  ;;  %v4090_v34 = vld [vmem:[#allocation5 + $0x68] ss:$16 sps:$4 sm:$0xff]   ;;  %v4097_v36 = vld [vmem:[#allocation5 + $0x40] ss:$16 sps:$4 sm:$0xff]  }
  0x3b   : > { %722 = vmatpush1.bf16.msra.mxu0 %v4034_v13  ;;  %763 = vmatpush1.bf16.msra.mxu1 %v4042_v15  ;;  %v4099_v37 = vld [vmem:[#allocation5 + $0x4c] ss:$16 sps:$4 sm:$0xff]   ;;  %v4103_v38 = vld [vmem:[#allocation5 + $0x48] ss:$16 sps:$4 sm:$0xff]   ;;  %v277_v39 = vld [vmem:[%s4003_s29 + $0x30] sm:$0xff]  ;;  %v295_v61 = vsub.s32 1, %v290_v53 }
  0x3c   : > { %723 = vmatprep.subr.bf16.mxu0 %v4052_v19  ;;  %764 = vmatprep.subr.bf16.mxu1 %v4057_v22  ;;  %v278_v40 = vld [vmem:[%s4003_s29 + $0x38] sm:$0xff]  ;;  %v4111_v41 = vld [vmem:[#allocation5 + $0x24] ss:$16 sps:$4 sm:$0xff]   ;;  %v4115_v42 = vld [vmem:[#allocation5 + $0x20] ss:$16 sps:$4 sm:$0xff]  }
  0x3d   : > { %v4117_v43 = vld [vmem:[#allocation5 + $0x2c] ss:$16 sps:$4 sm:$0xff]   ;;  %v282_v44 = vpack.c.bf16 %v278_v40, %v277_v39  ;;  %v4119_v45 = vld [vmem:[#allocation5 + $0x28] ss:$16 sps:$4 sm:$0xff]   ;;  %v4121_v46 = vld [vmem:[#allocation5 + $0x4] ss:$16 sps:$4 sm:$0xff]  }
  0x3e   : > { %3140 = vmatmul.mubr.msk.bf16.gmra.mxu0 %vm329_vm0, %v280_v20  ;;  %3144 = vmatmul.mubr.msk.bf16.gmra.mxu1 %vm329_vm0, %v280_v20  ;;  %v4124_v47 = vld [vmem:[#allocation5 + $0xc] ss:$16 sps:$4 sm:$0xff]   ;;  %v4129_v48 = vld [vmem:[#allocation5] ss:$16 sps:$4 sm:$0xff]   ;;  %v4133_v50 = vld [vmem:[#allocation5 + $0x8] ss:$16 sps:$4 sm:$0xff]  }
  0x3f   : > { %724 = vmatpush1.bf16.msra.mxu0 %v4055_v21  ;;  %394 = vmatprep.mubr.bf16.mxu0 %v4674_v3  ;;  %v520_v49 = vld [vmem:[#allocation3] sm:$0xff] }
  0x40   : > { %765 = vmatpush1.bf16.msra.mxu1 %v4060_v23  ;;  %725 = vmatprep.subr.bf16.mxu0 %v4064_v24  ;;  %v526_v51 = vpack.c.bf16 %v520_v49, %v520_v49  ;;  %v287_v57 = vld [vmem:[%s4669_s3] sm:$0xf] }
  0x41   : > { %766 = vmatprep.subr.bf16.mxu1 %v4067_v25  ;;  %467 = vmatprep.mubr.bf16.mxu1 %v4674_v3  ;;  %v4186_v60 = vrot.slane %v287_v57, %v299_v54  ;;  %v292_v0 = vrot.slane %v287_v57, %v291_v55  ;;  %v4192_v1 = vrot.slane %v287_v57, %v303_v56 }
  0x42   : > { %v296_v5 = vrot.slane %v287_v57, %v295_v61 }
  0x43   : > { %726 = vmatpush1.bf16.msra.mxu0 %v4071_v26 }
  0x44   : > { %767 = vmatpush1.bf16.msra.mxu1 %v4079_v29  ;;  %727 = vmatprep.subr.bf16.mxu0 %v4081_v30 }
  0x45   : > { %768 = vmatprep.subr.bf16.mxu1 %v4085_v31 }
  0x46   : > { %3141 = vmatmul.mubr.msk.bf16.gmra.mxu0 %vm329_vm0, %v281_v32  ;;  %3145 = vmatmul.mubr.msk.bf16.gmra.mxu1 %vm329_vm0, %v281_v32 }
  0x47   : > { %728 = vmatpush1.bf16.msra.mxu0 %v4088_v33  ;;  %404 = vmatprep.mubr.bf16.mxu0 %v4674_v3 }
  0x48   : > { %769 = vmatpush1.bf16.msra.mxu1 %v4090_v34  ;;  %729 = vmatprep.subr.bf16.mxu0 %v4094_v35 }
  0x49   : > { %770 = vmatprep.subr.bf16.mxu1 %v4099_v37  ;;  %477 = vmatprep.mubr.bf16.mxu1 %v4674_v3 }
  0x4b   : > { %730 = vmatpush1.bf16.msra.mxu0 %v4097_v36 }
  0x4c   : > { %771 = vmatpush1.bf16.msra.mxu1 %v4103_v38  ;;  %731 = vmatprep.subr.bf16.mxu0 %v4111_v41 }
  0x4d   : > { %772 = vmatprep.subr.bf16.mxu1 %v4117_v43 }
  0x4e   : > { %3142 = vmatmul.mubr.msk.bf16.gmra.mxu0 %vm329_vm0, %v282_v44  ;;  %3146 = vmatmul.mubr.msk.bf16.gmra.mxu1 %vm329_vm0, %v282_v44 }
  0x4f   : > { %732 = vmatpush1.bf16.msra.mxu0 %v4115_v42  ;;  %751 = vmatprep.mubr.bf16.mxu0 %v4674_v3 }
  0x50   : > { %773 = vmatpush1.bf16.msra.mxu1 %v4119_v45  ;;  %733 = vmatprep.subr.bf16.mxu0 %v4121_v46 }
  0x51   : > { %774 = vmatprep.subr.bf16.mxu1 %v4124_v47  ;;  %792 = vmatprep.mubr.bf16.mxu1 %v4674_v3 }
  0x53   : > { %734 = vmatpush1.bf16.msra.mxu0 %v4129_v48 }
  0x54   : > { %775 = vmatpush1.bf16.msra.mxu1 %v4133_v50  ;;  %1027 = vmatprep.subr.bf16.mxu0 %v4027_v10 }
  0x55   : > { %1068 = vmatprep.subr.bf16.mxu1 %v4031_v12 }
  0x56   : > { %752 = vmatmul.mubr.bf16.vlgmr.msra.gmra.mxu0 %v526_v51 }
  0x57   : > { %793 = vmatmul.mubr.bf16.vlgmr.msra.gmra.mxu1 %v526_v51  ;;  %1028 = vmatpush1.bf16.msra.mxu0 %v4025_v9 }
  0x58   : > { %1069 = vmatpush1.bf16.msra.mxu1 %v4029_v11  ;;  %1029 = vmatprep.subr.bf16.mxu0 %v4038_v14 }
  0x59   : > { %1070 = vmatprep.subr.bf16.mxu1 %v4044_v16  ;;  %1059 = vmatprep.mubr.bf16.mxu0 %v4674_v3 }
  0x5a   : > { %1100 = vmatprep.mubr.bf16.mxu1 %v4674_v3 }
  0x5b   : > { %1030 = vmatpush1.bf16.msra.mxu0 %v4034_v13 }
  0x5c   : > { %1071 = vmatpush1.bf16.msra.mxu1 %v4042_v15  ;;  %1031 = vmatprep.subr.bf16.mxu0 %v4052_v19 }
  0x5d   : > { %1072 = vmatprep.subr.bf16.mxu1 %v4057_v22 }
  0x5f   : > { %1032 = vmatpush1.bf16.msra.mxu0 %v4055_v21 }
  0x60   : > { %1073 = vmatpush1.bf16.msra.mxu1 %v4060_v23  ;;  %1033 = vmatprep.subr.bf16.mxu0 %v4064_v24 }
  0x61   : > { %1074 = vmatprep.subr.bf16.mxu1 %v4067_v25 }
  0x63   : > { %1034 = vmatpush1.bf16.msra.mxu0 %v4071_v26 }
  0x64   : > { %1075 = vmatpush1.bf16.msra.mxu1 %v4079_v29  ;;  %1035 = vmatprep.subr.bf16.mxu0 %v4081_v30 }
  0x65   : > { %1076 = vmatprep.subr.bf16.mxu1 %v4085_v31 }
  0x67   : > { %1036 = vmatpush1.bf16.msra.mxu0 %v4088_v33 }
  0x68   : > { %1077 = vmatpush1.bf16.msra.mxu1 %v4090_v34  ;;  %1037 = vmatprep.subr.bf16.mxu0 %v4094_v35 }
  0x69   : > { %1078 = vmatprep.subr.bf16.mxu1 %v4099_v37 }
  0x6b   : > { %1038 = vmatpush1.bf16.msra.mxu0 %v4097_v36 }
  0x6c   : > { %1079 = vmatpush1.bf16.msra.mxu1 %v4103_v38  ;;  %1039 = vmatprep.subr.bf16.mxu0 %v4111_v41 }
  0x6d   : > { %1080 = vmatprep.subr.bf16.mxu1 %v4117_v43 }
  0x6f   : > { %1040 = vmatpush1.bf16.msra.mxu0 %v4115_v42 }
  0x70   : > { %1081 = vmatpush1.bf16.msra.mxu1 %v4119_v45  ;;  %1041 = vmatprep.subr.bf16.mxu0 %v4121_v46 }
  0x71   : > { %1082 = vmatprep.subr.bf16.mxu1 %v4124_v47 }
  0x73   : > { %1042 = vmatpush1.bf16.msra.mxu0 %v4129_v48 }
  0x74   : > { %1083 = vmatpush1.bf16.msra.mxu1 %v4133_v50  ;;  %1335 = vmatprep.subr.bf16.mxu0 %v4027_v10 }
  0x75   : > { %1376 = vmatprep.subr.bf16.mxu1 %v4031_v12 }
  0xf6   : > { %v4182_v58 = vpop.f32.mrf.mxu0  ;;  %v4184_v59 = vpop.f32.mrf.mxu1 }
  0xf8   : > { %v4188_v62 = vpop.f32.mrf.mxu0  ;;  %v4190_v63 = vpop.f32.mrf.mxu1 }
  0xfa   : > { %v380_v2 = vpop.f32.mrf.mxu0  ;;  %v453_v4 = vpop.f32.mrf.mxu1 }
  0xfb   : > { %v4194_v6 = vadd.f32 %v380_v2, %v292_v0  ;;  %v4197_v7 = vadd.f32 %v453_v4, %v4186_v60 }
  0xfc   : > { %v382_v8 = vpop.f32.mrf.mxu0  ;;  %v455_v17 = vpop.f32.mrf.mxu1 }
  0xfd   : > { %v4199_v18 = vadd.f32 %v382_v8, %v296_v5  ;;  %v4202_v20 = vadd.f32 %v455_v17, %v4192_v1 }
  0xfe   : > { %v386_v27 = vpop.f32.mrf.mxu0  ;;  %v459_v28 = vpop.f32.mrf.mxu1 }
  0xff   : > { %v4204_v32 = vadd.f32 %v386_v27, %v292_v0  ;;  %v4207_v39 = vadd.f32 %v459_v28, %v4186_v60 }
 0x100   : > { %v388_v40 = vpop.f32.mrf.mxu0  ;;  %v461_v44 = vpop.f32.mrf.mxu1 }
 0x101   : > { %v4209_v49 = vadd.f32 %v388_v40, %v296_v5  ;;  %v4212_v51 = vadd.f32 %v461_v44, %v4192_v1 }
 0x102   : > { %v390_v52 = vpop.f32.mrf.mxu0  ;;  %v463_v53 = vpop.f32.mrf.mxu1 }
 0x103   : > { %4680 = vst [vmem:[#allocation15_spill] sm:$0xff] %v4212_v51  ;;  %v4214_v54 = vadd.f32 %v390_v52, %v292_v0  ;;  %v4217_v55 = vadd.f32 %v463_v53, %v4186_v60 }
 0x104   : > { %v392_v56 = vpop.f32.mrf.mxu0  ;;  %v465_v57 = vpop.f32.mrf.mxu1 }
 0x105   : > { %4681 = vst [vmem:[#allocation16_spill] sm:$0xff] %v4214_v54  ;;  %4682 = vst [vmem:[#allocation17_spill] sm:$0xff] %v4217_v55  ;;  %v4219_v61 = vadd.f32 %v392_v56, %v296_v5  ;;  %v4222_v2 = vadd.f32 %v465_v57, %v4192_v1 }
 0x106   : > { %v396_v4 = vpop.f32.mrf.mxu0  ;;  %v469_v8 = vpop.f32.mrf.mxu1 }
 0x107   : > { %4683 = vst [vmem:[#allocation18_spill] sm:$0xff] %v4219_v61  ;;  %4684 = vst [vmem:[#allocation19_spill] sm:$0xff] %v4222_v2  ;;  %v4224_v17 = vadd.f32 %v396_v4, %v292_v0  ;;  %v4227_v27 = vadd.f32 %v469_v8, %v4186_v60 }
 0x108   : > { %v398_v28 = vpop.f32.mrf.mxu0  ;;  %v471_v40 = vpop.f32.mrf.mxu1 }
 0x109   : > { %4685 = vst [vmem:[#allocation20_spill] sm:$0xff] %v4224_v17  ;;  %4686 = vst [vmem:[#allocation21_spill] sm:$0xff] %v4227_v27  ;;  %v4229_v44 = vadd.f32 %v398_v28, %v296_v5  ;;  %v4232_v52 = vadd.f32 %v471_v40, %v4192_v1 }
 0x10a   : > { %v400_v53 = vpop.f32.mrf.mxu0  ;;  %v473_v56 = vpop.f32.mrf.mxu1 }
 0x10b   : > { %4687 = vst [vmem:[#allocation22_spill] sm:$0xff] %v4229_v44  ;;  %4688 = vst [vmem:[#allocation23_spill] sm:$0xff] %v4232_v52  ;;  %v4234_v3 = vadd.f32 %v400_v53, %v292_v0  ;;  %v4237_v57 = vadd.f32 %v473_v56, %v4186_v60 }
 0x10c   : > { %v402_v2 = vpop.f32.mrf.mxu0  ;;  %v475_v4 = vpop.f32.mrf.mxu1 }
 0x10d   : > { %4689 = vst [vmem:[#allocation24_spill] sm:$0xff] %v4234_v3  ;;  %4690 = vst [vmem:[#allocation25_spill] sm:$0xff] %v4237_v57  ;;  %v4239_v17 = vadd.f32 %v402_v2, %v296_v5  ;;  %v4242_v8 = vadd.f32 %v475_v4, %v4192_v1 }
 0x10e   : > { %v406_v27 = vpop.f32.mrf.mxu0  ;;  %v479_v28 = vpop.f32.mrf.mxu1 }
 0x10f   : > { %4691 = vst [vmem:[#allocation26_spill] sm:$0xff] %v4239_v17  ;;  %4692 = vst [vmem:[#allocation27_spill] sm:$0xff] %v4242_v8  ;;  %v4244_v44 = vadd.f32 %v406_v27, %v292_v0  ;;  %v4247_v40 = vadd.f32 %v479_v28, %v4186_v60 }
 0x110   : > { %v408_v52 = vpop.f32.mrf.mxu0  ;;  %v481_v53 = vpop.f32.mrf.mxu1 }
 0x111   : > { %4693 = vst [vmem:[#allocation28_spill] sm:$0xff] %v4244_v44  ;;  %4694 = vst [vmem:[#allocation29_spill] sm:$0xff] %v4247_v40  ;;  %v4249_v3 = vadd.f32 %v408_v52, %v296_v5  ;;  %v4252_v56 = vadd.f32 %v481_v53, %v4192_v1  ;;  %v377_v44 = vadd.f32 %v4182_v58, %v292_v0 }
 0x112   : > { %v410_v57 = vpop.f32.mrf.mxu0  ;;  %v483_v2 = vpop.f32.mrf.mxu1  ;;  %v379_v53 = vadd.f32 %v4188_v62, %v296_v5  ;;  %v452_v62 = vadd.f32 %v4190_v63, %v4192_v1 }
 0x113   : > { %4695 = vst [vmem:[#allocation30_spill] sm:$0xff] %v4249_v3  ;;  %4696 = vst [vmem:[#allocation31_spill] sm:$0xff] %v4252_v56  ;;  %v4254_v17 = vadd.f32 %v410_v57, %v292_v0  ;;  %v4257_v4 = vadd.f32 %v483_v2, %v4186_v60  ;;  %v450_v0 = vadd.f32 %v4184_v59, %v4186_v60 }
 0x114   : > { %v412_v8 = vpop.f32.mrf.mxu0  ;;  %v485_v27 = vpop.f32.mrf.mxu1 }
 0x115   : > { %4697 = vst [vmem:[#allocation32_spill] sm:$0xff] %v4254_v17  ;;  %4698 = vst [vmem:[#allocation33_spill] sm:$0xff] %v4257_v4  ;;  %v4260_v28 = vadd.f32 %v412_v8, %v296_v5  ;;  %v4263_v40 = vadd.f32 %v485_v27, %v4192_v1 }
 0x116   : > { %v753_v52 = vpop.f32.mrf.mxu0 }
 0x117   : > { %v801_v56 = vadd.f32 %v753_v52, %v377_v44  ;;  %v794_v3 = vpop.f32.mrf.mxu1 }
 0x118   : > { %v755_v55 = vpop.f32.mrf.mxu0  ;;  %v803_v8 = vadd.f32 %v794_v3, %v450_v0 }
 0x119   : > { %v3179_v57 = vmul.f32 -1.442695, %v801_v56  ;;  %v802_v17 = vadd.f32 %v755_v55, %v379_v53  ;;  %v796_v61 = vpop.f32.mrf.mxu1 }
 0x11a   : > { %v757_v2 = vpop.f32.mrf.mxu0  ;;  %v3181_v5 = vmul.f32 -1.442695, %v803_v8  ;;  %v804_v27 = vadd.f32 %v796_v61, %v452_v62 }
 0x11b   : > { %3610 = vpow2.f32 %v3179_v57  ;;  %v3180_v4 = vmul.f32 -1.442695, %v802_v17  ;;  %v798_v54 = vpop.f32.mrf.mxu1  ;;  %v521_v17 = vld [vmem:[#allocation4] sm:$0xff] }
 0x11c   : > { %v758_v51 = vpop.f32.mrf.mxu0 }
 0x11d   : > { %3612 = vpow2.f32 %v3180_v4  ;;  %v799_v58 = vpop.f32.mrf.mxu1 }
 0x11e   : > { %3614 = vpow2.f32 %v3181_v5  ;;  %v4699_v58 = vmov 0  }
 0x128   : > { %v3611_v44 = vpop.eup %3610 }
 0x129   : > { %v814_v56 = vadd.f32 1.0, %v3611_v44 }
 0x12a   : > { %v3613_v55 = vpop.eup %3612 }
 0x12b   : > { %3616 = vrcp.f32 %v814_v56  ;;  %v815_v52 = vadd.f32 1.0, %v3613_v55  ;;  %v3615_v51 = vpop.eup %3614 }
 0x12c   : > { %3618 = vtanh.f32 %v804_v27  ;;  %v816_v3 = vadd.f32 1.0, %v3615_v51 }
 0x12d   : > { %3620 = vrcp.f32 %v815_v52 }
 0x12e   : > { %3622 = vrcp.f32 %v816_v3 }
 0x138   : > { %v3617_v54 = vpop.eup %3616 }
 0x139   : > { %v3619_v4 = vpop.eup %3618  ;;  %v824_v60 = vmul.f32 %v3617_v54, %v521_v17 }
 0x13a   : > { %v3621_v59 = vpop.eup %3620 }
 0x13b   : > { %v825_v53 = vmul.f32 %v3621_v59, %v3619_v4  ;;  %v3623_v1 = vpop.eup %3622 }
 0x13d   : > { %v4270_v63 = vadd.f32 %v825_v53, %v824_v60 }
 0x13f   : > { %3624 = vtanh.f32 %v4270_v63 }
 0x14c   : > { %v3625_v61 = vpop.eup %3624 }
 0x14d   : > { %v828_v57 = vmul.f32 %v3625_v61, %v3623_v1 }
 0x14f   : > { %829 = vst [vmem:[%s4005_s9] sm:$0xff] %v828_v57  ;;  %v834_v2 = vpack.c.bf16 %v828_v57, %v828_v57 }
 0x151   : > { %1060 = vmatmul.mubr.bf16.vlgmr.msra.gmra.mxu0 %v834_v2  ;;  %1101 = vmatmul.mubr.bf16.vlgmr.msra.gmra.mxu1 %v834_v2 }
 0x152   : > { %1336 = vmatpush1.bf16.msra.mxu0 %v4025_v9  ;;  %1377 = vmatpush1.bf16.msra.mxu1 %v4029_v11 }
 0x153   : > { %1337 = vmatprep.subr.bf16.mxu0 %v4038_v14  ;;  %1378 = vmatprep.subr.bf16.mxu1 %v4044_v16 }
 0x154   : > { %1367 = vmatprep.mubr.bf16.mxu0 %v4699_v58  ;;  %1408 = vmatprep.mubr.bf16.mxu1 %v4699_v58 }
 0x156   : > { %1338 = vmatpush1.bf16.msra.mxu0 %v4034_v13  ;;  %1379 = vmatpush1.bf16.msra.mxu1 %v4042_v15 }
 0x157   : > { %1339 = vmatprep.subr.bf16.mxu0 %v4052_v19  ;;  %1380 = vmatprep.subr.bf16.mxu1 %v4057_v22 }
 0x15a   : > { %1340 = vmatpush1.bf16.msra.mxu0 %v4055_v21  ;;  %1381 = vmatpush1.bf16.msra.mxu1 %v4060_v23 }
 0x15b   : > { %1341 = vmatprep.subr.bf16.mxu0 %v4064_v24  ;;  %1382 = vmatprep.subr.bf16.mxu1 %v4067_v25 }
 0x15e   : > { %1342 = vmatpush1.bf16.msra.mxu0 %v4071_v26  ;;  %1383 = vmatpush1.bf16.msra.mxu1 %v4079_v29 }
 0x15f   : > { %1343 = vmatprep.subr.bf16.mxu0 %v4081_v30  ;;  %1384 = vmatprep.subr.bf16.mxu1 %v4085_v31 }
 0x162   : > { %1344 = vmatpush1.bf16.msra.mxu0 %v4088_v33  ;;  %1385 = vmatpush1.bf16.msra.mxu1 %v4090_v34 }
 0x163   : > { %1345 = vmatprep.subr.bf16.mxu0 %v4094_v35  ;;  %1386 = vmatprep.subr.bf16.mxu1 %v4099_v37 }
 0x166   : > { %1346 = vmatpush1.bf16.msra.mxu0 %v4097_v36  ;;  %1387 = vmatpush1.bf16.msra.mxu1 %v4103_v38 }
 0x167   : > { %1347 = vmatprep.subr.bf16.mxu0 %v4111_v41  ;;  %1388 = vmatprep.subr.bf16.mxu1 %v4117_v43 }
 0x16a   : > { %1348 = vmatpush1.bf16.msra.mxu0 %v4115_v42  ;;  %1389 = vmatpush1.bf16.msra.mxu1 %v4119_v45 }
 0x16b   : > { %1349 = vmatprep.subr.bf16.mxu0 %v4121_v46  ;;  %1390 = vmatprep.subr.bf16.mxu1 %v4124_v47 }
 0x16e   : > { %1350 = vmatpush1.bf16.msra.mxu0 %v4129_v48  ;;  %1391 = vmatpush1.bf16.msra.mxu1 %v4133_v50 }
 0x16f   : > { %1643 = vmatprep.subr.bf16.mxu0 %v4027_v10  ;;  %1684 = vmatprep.subr.bf16.mxu1 %v4031_v12 }
 0x211   : > { %v1061_v0 = vpop.f32.mrf.mxu0  ;;  %v1102_v8 = vpop.f32.mrf.mxu1 }
 0x212   : > { %v1109_v62 = vadd.f32 %v1061_v0, %v4194_v6  ;;  %v1111_v10 = vadd.f32 %v1102_v8, %v4197_v7 }
 0x213   : > { %v1063_v5 = vpop.f32.mrf.mxu0  ;;  %v1104_v44 = vpop.f32.mrf.mxu1 }
 0x214   : > { %v3214_v27 = vmul.f32 -1.442695, %v1109_v62  ;;  %v1110_v56 = vadd.f32 %v1063_v5, %v4199_v18  ;;  %v3216_v4 = vmul.f32 -1.442695, %v1111_v10  ;;  %v1112_v59 = vadd.f32 %v1104_v44, %v4202_v20  ;;  %v4364_v44 = vld [vmem:[#allocation5 + $0xe0] ss:$16 sps:$4 sm:$0xff]  }
 0x215   : > { %v1065_v55 = vpop.f32.mrf.mxu0  ;;  %v1106_v52 = vpop.f32.mrf.mxu1  ;;  %v4388_v10 = vld [vmem:[#allocation5 + $0xa0] ss:$16 sps:$4 sm:$0xff]  }
 0x216   : > { %3626 = vpow2.f32 %v3214_v27  ;;  %v3215_v51 = vmul.f32 -1.442695, %v1110_v56  ;;  %v4366_v27 = vld [vmem:[#allocation5 + $0xe8] ss:$16 sps:$4 sm:$0xff]   ;;  %v4372_v56 = vld [vmem:[#allocation5 + $0xc4] ss:$16 sps:$4 sm:$0xff]  }
 0x217   : > { %v1066_v54 = vpop.f32.mrf.mxu0  ;;  %v1107_v17 = vpop.f32.mrf.mxu1  ;;  %v4374_v55 = vld [vmem:[#allocation5 + $0xcc] ss:$16 sps:$4 sm:$0xff]   ;;  %v4376_v52 = vld [vmem:[#allocation5 + $0xc0] ss:$16 sps:$4 sm:$0xff]  }
 0x218   : > { %3628 = vpow2.f32 %v3215_v51  ;;  %v4378_v51 = vld [vmem:[#allocation5 + $0xc8] ss:$16 sps:$4 sm:$0xff]   ;;  %v4384_v54 = vld [vmem:[#allocation5 + $0xa4] ss:$16 sps:$4 sm:$0xff]   ;;  %v4386_v17 = vld [vmem:[#allocation5 + $0xac] ss:$16 sps:$4 sm:$0xff]  }
 0x219   : > { %3630 = vpow2.f32 %v3216_v4  ;;  %v4390_v4 = vld [vmem:[#allocation5 + $0xa8] ss:$16 sps:$4 sm:$0xff]  }
 0x223   : > { %v3627_v12 = vpop.eup %3626 }
 0x224   : > { %v1122_v3 = vadd.f32 1.0, %v3627_v12  ;;  %v4396_v12 = vld [vmem:[#allocation5 + $0x84] ss:$16 sps:$4 sm:$0xff]  }
 0x225   : > { %v3629_v6 = vpop.eup %3628 }
 0x226   : > { %3632 = vrcp.f32 %v1122_v3  ;;  %v1123_v60 = vadd.f32 1.0, %v3629_v6  ;;  %v3631_v18 = vpop.eup %3630  ;;  %v4400_v3 = vld [vmem:[#allocation5 + $0x80] ss:$16 sps:$4 sm:$0xff]   ;;  %v4402_v6 = vld [vmem:[#allocation5 + $0x88] ss:$16 sps:$4 sm:$0xff]  }
 0x227   : > { %3634 = vtanh.f32 %v1112_v59  ;;  %v1124_v57 = vadd.f32 1.0, %v3631_v18  ;;  %v4398_v59 = vld [vmem:[#allocation5 + $0x8c] ss:$16 sps:$4 sm:$0xff]  }
 0x228   : > { %3636 = vrcp.f32 %v1123_v60  ;;  %v4406_v60 = vld [vmem:[#allocation5 + $0x64] ss:$16 sps:$4 sm:$0xff]   ;;  %v4408_v18 = vld [vmem:[#allocation5 + $0x6c] ss:$16 sps:$4 sm:$0xff]  }
 0x229   : > { %3638 = vrcp.f32 %v1124_v57  ;;  %v4420_v57 = vld [vmem:[#allocation5 + $0x4c] ss:$16 sps:$4 sm:$0xff]  }
 0x233   : > { %v3633_v53 = vpop.eup %3632 }
 0x234   : > { %v3635_v1 = vpop.eup %3634  ;;  %v1132_v2 = vmul.f32 %v3633_v53, %v4270_v63  ;;  %v4362_v63 = vld [vmem:[#allocation5 + $0xec] ss:$16 sps:$4 sm:$0xff]   ;;  %v4412_v53 = vld [vmem:[#allocation5 + $0x60] ss:$16 sps:$4 sm:$0xff]  }
 0x235   : > { %v3637_v61 = vpop.eup %3636 }
 0x236   : > { %v1133_v7 = vmul.f32 %v3637_v61, %v3635_v1  ;;  %v3639_v20 = vpop.eup %3638  ;;  %v4414_v1 = vld [vmem:[#allocation5 + $0x68] ss:$16 sps:$4 sm:$0xff]   ;;  %v4418_v61 = vld [vmem:[#allocation5 + $0x44] ss:$16 sps:$4 sm:$0xff]  }
 0x238   : > { %v4313_v0 = vadd.f32 %v1133_v7, %v1132_v2  ;;  %v4424_v2 = vld [vmem:[#allocation5 + $0x40] ss:$16 sps:$4 sm:$0xff]   ;;  %v4426_v7 = vld [vmem:[#allocation5 + $0x48] ss:$16 sps:$4 sm:$0xff]  }
 0x23a   : > { %3640 = vtanh.f32 %v4313_v0 }
 0x247   : > { %v3641_v8 = vpop.eup %3640 }
 0x248   : > { %v1136_v62 = vmul.f32 %v3641_v8, %v3639_v20  ;;  %v4432_v20 = vld [vmem:[#allocation5 + $0x2c] ss:$16 sps:$4 sm:$0xff]   ;;  %v4436_v8 = vld [vmem:[#allocation5 + $0x20] ss:$16 sps:$4 sm:$0xff]  }
 0x24a   : > { %1137 = vst [vmem:[%s4005_s9 + $0x8] sm:$0xff] %v1136_v62  ;;  %v1142_v5 = vpack.c.bf16 %v1136_v62, %v1136_v62  ;;  %v4438_v62 = vld [vmem:[#allocation5 + $0x28] ss:$16 sps:$4 sm:$0xff]  }
 0x24c   : > { %1368 = vmatmul.mubr.bf16.vlgmr.msra.gmra.mxu0 %v1142_v5  ;;  %1409 = vmatmul.mubr.bf16.vlgmr.msra.gmra.mxu1 %v1142_v5  ;;  %v4442_v5 = vld [vmem:[#allocation5 + $0x4] ss:$16 sps:$4 sm:$0xff]  }
 0x24d   : > { %1644 = vmatpush1.bf16.msra.mxu0 %v4025_v9  ;;  %1685 = vmatpush1.bf16.msra.mxu1 %v4029_v11 }
 0x24e   : > { %1645 = vmatprep.subr.bf16.mxu0 %v4038_v14  ;;  %1686 = vmatprep.subr.bf16.mxu1 %v4044_v16 }
 0x24f   : > { %1675 = vmatprep.mubr.bf16.mxu0 %v4699_v58  ;;  %1716 = vmatprep.mubr.bf16.mxu1 %v4699_v58 }
 0x251   : > { %1646 = vmatpush1.bf16.msra.mxu0 %v4034_v13  ;;  %1687 = vmatpush1.bf16.msra.mxu1 %v4042_v15 }
 0x252   : > { %1647 = vmatprep.subr.bf16.mxu0 %v4052_v19  ;;  %1688 = vmatprep.subr.bf16.mxu1 %v4057_v22 }
 0x255   : > { %1648 = vmatpush1.bf16.msra.mxu0 %v4055_v21  ;;  %1689 = vmatpush1.bf16.msra.mxu1 %v4060_v23 }
 0x256   : > { %1649 = vmatprep.subr.bf16.mxu0 %v4064_v24  ;;  %1690 = vmatprep.subr.bf16.mxu1 %v4067_v25 }
 0x259   : > { %1650 = vmatpush1.bf16.msra.mxu0 %v4071_v26  ;;  %1691 = vmatpush1.bf16.msra.mxu1 %v4079_v29 }
 0x25a   : > { %1651 = vmatprep.subr.bf16.mxu0 %v4081_v30  ;;  %1692 = vmatprep.subr.bf16.mxu1 %v4085_v31  ;;  %v4700_v31 = vld [vmem:[#allocation15_spill] sm:$0xff] }
 0x25d   : > { %1652 = vmatpush1.bf16.msra.mxu0 %v4088_v33  ;;  %1693 = vmatpush1.bf16.msra.mxu1 %v4090_v34 }
 0x25e   : > { %1653 = vmatprep.subr.bf16.mxu0 %v4094_v35  ;;  %1694 = vmatprep.subr.bf16.mxu1 %v4099_v37 }
 0x261   : > { %1654 = vmatpush1.bf16.msra.mxu0 %v4097_v36  ;;  %1695 = vmatpush1.bf16.msra.mxu1 %v4103_v38 }
 0x262   : > { %1655 = vmatprep.subr.bf16.mxu0 %v4111_v41  ;;  %1696 = vmatprep.subr.bf16.mxu1 %v4117_v43 }
 0x265   : > { %1656 = vmatpush1.bf16.msra.mxu0 %v4115_v42  ;;  %1697 = vmatpush1.bf16.msra.mxu1 %v4119_v45 }
 0x266   : > { %1657 = vmatprep.subr.bf16.mxu0 %v4121_v46  ;;  %1698 = vmatprep.subr.bf16.mxu1 %v4124_v47 }
 0x269   : > { %1658 = vmatpush1.bf16.msra.mxu0 %v4129_v48  ;;  %1699 = vmatpush1.bf16.msra.mxu1 %v4133_v50 }
 0x26a   : > { %1992 = vmatprep.subr.bf16.mxu1 %v4362_v63 }
 0x30c   : > { %v1369_v9 = vpop.f32.mrf.mxu0  ;;  %v1410_v11 = vpop.f32.mrf.mxu1 }
 0x30d   : > { %v1417_v13 = vadd.f32 %v1369_v9, %v4204_v32  ;;  %v1419_v26 = vadd.f32 %v1410_v11, %v4207_v39  ;;  %v4444_v9 = vld [vmem:[#allocation5 + $0xc] ss:$16 sps:$4 sm:$0xff]   ;;  %v4448_v11 = vld [vmem:[#allocation5] ss:$16 sps:$4 sm:$0xff]  }
 0x30e   : > { %v1371_v14 = vpop.f32.mrf.mxu0  ;;  %v1412_v15 = vpop.f32.mrf.mxu1 }
 0x30f   : > { %v3249_v16 = vmul.f32 -1.442695, %v1417_v13  ;;  %v1418_v19 = vadd.f32 %v1371_v14, %v4209_v49  ;;  %v3251_v29 = vmul.f32 -1.442695, %v1419_v26  ;;  %v1420_v33 = vadd.f32 %v1412_v15, %v4700_v31  ;;  %v4360_v49 = vld [vmem:[#allocation5 + $0xe4] ss:$16 sps:$4 sm:$0xff]  }
 0x310   : > { %v1373_v21 = vpop.f32.mrf.mxu0  ;;  %v1414_v22 = vpop.f32.mrf.mxu1  ;;  %1951 = vmatprep.subr.bf16.mxu0 %v4360_v49  ;;  %v4450_v13 = vld [vmem:[#allocation5 + $0x8] ss:$16 sps:$4 sm:$0xff]  }
 0x311   : > { %3642 = vpow2.f32 %v3249_v16  ;;  %v3250_v23 = vmul.f32 -1.442695, %v1418_v19  ;;  %v4701_v16 = vld [vmem:[#allocation16_spill] sm:$0xff] }
 0x312   : > { %v1374_v24 = vpop.f32.mrf.mxu0  ;;  %v1415_v25 = vpop.f32.mrf.mxu1 }
 0x313   : > { %3644 = vpow2.f32 %v3250_v23  ;;  %v4702_v24 = vld [vmem:[#allocation18_spill] sm:$0xff] }
 0x314   : > { %3646 = vpow2.f32 %v3251_v29 }
 0x31e   : > { %v3643_v30 = vpop.eup %3642 }
 0x31f   : > { %v1430_v34 = vadd.f32 1.0, %v3643_v30 }
 0x320   : > { %v3645_v35 = vpop.eup %3644 }
 0x321   : > { %3648 = vrcp.f32 %v1430_v34  ;;  %v1431_v36 = vadd.f32 1.0, %v3645_v35  ;;  %v3647_v37 = vpop.eup %3646  ;;  %v4703_v34 = vld [vmem:[#allocation17_spill] sm:$0xff] }
 0x322   : > { %3650 = vtanh.f32 %v1420_v33  ;;  %v1432_v43 = vadd.f32 1.0, %v3647_v37 }
 0x323   : > { %3652 = vrcp.f32 %v1431_v36 }
 0x324   : > { %3654 = vrcp.f32 %v1432_v43 }
 0x32e   : > { %v3649_v38 = vpop.eup %3648 }
 0x32f   : > { %v3651_v41 = vpop.eup %3650  ;;  %v1440_v45 = vmul.f32 %v3649_v38, %v4313_v0  ;;  %v4430_v0 = vld [vmem:[#allocation5 + $0x24] ss:$16 sps:$4 sm:$0xff]  }
 0x330   : > { %v3653_v42 = vpop.eup %3652  ;;  %v4704_v38 = vld [vmem:[#allocation19_spill] sm:$0xff] }
 0x331   : > { %v1441_v46 = vmul.f32 %v3653_v42, %v3651_v41  ;;  %v3655_v48 = vpop.eup %3654 }
 0x333   : > { %v4354_v47 = vadd.f32 %v1441_v46, %v1440_v45 }
 0x335   : > { %3656 = vtanh.f32 %v4354_v47 }
 0x342   : > { %v3657_v50 = vpop.eup %3656 }
 0x343   : > { %v1444_v32 = vmul.f32 %v3657_v50, %v3655_v48 }
 0x345   : > { %1445 = vst [vmem:[%s4005_s9 + $0x10] sm:$0xff] %v1444_v32  ;;  %v1450_v39 = vpack.c.bf16 %v1444_v32, %v1444_v32 }
 0x347   : > { %1676 = vmatmul.mubr.bf16.vlgmr.msra.gmra.mxu0 %v1450_v39  ;;  %1717 = vmatmul.mubr.bf16.vlgmr.msra.gmra.mxu1 %v1450_v39 }
 0x348   : > { %1983 = vmatprep.mubr.bf16.mxu0 %v4699_v58  ;;  %2024 = vmatprep.mubr.bf16.mxu1 %v4699_v58 }
 0x349   : > { %1952 = vmatpush1.bf16.msra.mxu0 %v4364_v44  ;;  %1993 = vmatpush1.bf16.msra.mxu1 %v4366_v27 }
 0x34a   : > { %1953 = vmatprep.subr.bf16.mxu0 %v4372_v56  ;;  %1994 = vmatprep.subr.bf16.mxu1 %v4374_v55 }
 0x34d   : > { %1954 = vmatpush1.bf16.msra.mxu0 %v4376_v52  ;;  %1995 = vmatpush1.bf16.msra.mxu1 %v4378_v51 }
 0x34e   : > { %1955 = vmatprep.subr.bf16.mxu0 %v4384_v54  ;;  %1996 = vmatprep.subr.bf16.mxu1 %v4386_v17 }
 0x351   : > { %1956 = vmatpush1.bf16.msra.mxu0 %v4388_v10  ;;  %1997 = vmatpush1.bf16.msra.mxu1 %v4390_v4 }
 0x352   : > { %1957 = vmatprep.subr.bf16.mxu0 %v4396_v12  ;;  %1998 = vmatprep.subr.bf16.mxu1 %v4398_v59 }
 0x355   : > { %1958 = vmatpush1.bf16.msra.mxu0 %v4400_v3  ;;  %1999 = vmatpush1.bf16.msra.mxu1 %v4402_v6 }
 0x356   : > { %1959 = vmatprep.subr.bf16.mxu0 %v4406_v60  ;;  %2000 = vmatprep.subr.bf16.mxu1 %v4408_v18 }
 0x359   : > { %1960 = vmatpush1.bf16.msra.mxu0 %v4412_v53  ;;  %2001 = vmatpush1.bf16.msra.mxu1 %v4414_v1 }
 0x35a   : > { %1961 = vmatprep.subr.bf16.mxu0 %v4418_v61  ;;  %2002 = vmatprep.subr.bf16.mxu1 %v4420_v57 }
 0x35d   : > { %1962 = vmatpush1.bf16.msra.mxu0 %v4424_v2  ;;  %2003 = vmatpush1.bf16.msra.mxu1 %v4426_v7 }
 0x35e   : > { %1963 = vmatprep.subr.bf16.mxu0 %v4430_v0  ;;  %2004 = vmatprep.subr.bf16.mxu1 %v4432_v20 }
 0x361   : > { %1964 = vmatpush1.bf16.msra.mxu0 %v4436_v8  ;;  %2005 = vmatpush1.bf16.msra.mxu1 %v4438_v62 }
 0x362   : > { %1965 = vmatprep.subr.bf16.mxu0 %v4442_v5  ;;  %2006 = vmatprep.subr.bf16.mxu1 %v4444_v9 }
 0x365   : > { %1966 = vmatpush1.bf16.msra.mxu0 %v4448_v11  ;;  %2007 = vmatpush1.bf16.msra.mxu1 %v4450_v13 }
 0x366   : > { %2259 = vmatprep.subr.bf16.mxu0 %v4360_v49  ;;  %2300 = vmatprep.subr.bf16.mxu1 %v4362_v63 }
 0x407   : > { %v1677_v14 = vpop.f32.mrf.mxu0  ;;  %v1718_v15 = vpop.f32.mrf.mxu1 }
 0x408   : > { %v1725_v19 = vadd.f32 %v1677_v14, %v4701_v16  ;;  %v1727_v35 = vadd.f32 %v1718_v15, %v4703_v34 }
 0x409   : > { %v1679_v21 = vpop.f32.mrf.mxu0  ;;  %v1720_v22 = vpop.f32.mrf.mxu1 }
 0x40a   : > { %v3284_v23 = vmul.f32 -1.442695, %v1725_v19  ;;  %v1726_v25 = vadd.f32 %v1679_v21, %v4702_v24  ;;  %v3286_v36 = vmul.f32 -1.442695, %v1727_v35  ;;  %v1728_v41 = vadd.f32 %v1720_v22, %v4704_v38 }
 0x40b   : > { %v1681_v26 = vpop.f32.mrf.mxu0  ;;  %v1722_v29 = vpop.f32.mrf.mxu1 }
 0x40c   : > { %3658 = vpow2.f32 %v3284_v23  ;;  %v3285_v30 = vmul.f32 -1.442695, %v1726_v25  ;;  %v4705_v25 = vld [vmem:[#allocation20_spill] sm:$0xff] }
 0x40d   : > { %v1682_v31 = vpop.f32.mrf.mxu0  ;;  %v1723_v33 = vpop.f32.mrf.mxu1 }
 0x40e   : > { %3660 = vpow2.f32 %v3285_v30  ;;  %v4706_v33 = vld [vmem:[#allocation22_spill] sm:$0xff] }
 0x40f   : > { %3662 = vpow2.f32 %v3286_v36 }
 0x419   : > { %v3659_v37 = vpop.eup %3658 }
 0x41a   : > { %v1738_v42 = vadd.f32 1.0, %v3659_v37 }
 0x41b   : > { %v3661_v43 = vpop.eup %3660 }
 0x41c   : > { %3664 = vrcp.f32 %v1738_v42  ;;  %v1739_v45 = vadd.f32 1.0, %v3661_v43  ;;  %v3663_v46 = vpop.eup %3662  ;;  %v4707_v42 = vld [vmem:[#allocation21_spill] sm:$0xff] }
 0x41d   : > { %3666 = vtanh.f32 %v1728_v41  ;;  %v1740_v39 = vadd.f32 1.0, %v3663_v46 }
 0x41e   : > { %3668 = vrcp.f32 %v1739_v45 }
 0x41f   : > { %3670 = vrcp.f32 %v1740_v39 }
 0x429   : > { %v3665_v48 = vpop.eup %3664 }
 0x42a   : > { %v3667_v50 = vpop.eup %3666  ;;  %v1748_v14 = vmul.f32 %v3665_v48, %v4354_v47  ;;  %v4708_v48 = vld [vmem:[#allocation23_spill] sm:$0xff] }
 0x42b   : > { %v3669_v32 = vpop.eup %3668 }
 0x42c   : > { %v1749_v15 = vmul.f32 %v3669_v32, %v3667_v50  ;;  %v3671_v19 = vpop.eup %3670 }
 0x42e   : > { %v4463_v16 = vadd.f32 %v1749_v15, %v1748_v14 }
 0x430   : > { %3672 = vtanh.f32 %v4463_v16 }
 0x43d   : > { %v3673_v21 = vpop.eup %3672 }
 0x43e   : > { %v1752_v22 = vmul.f32 %v3673_v21, %v3671_v19 }
 0x440   : > { %1753 = vst [vmem:[%s4005_s9 + $0x18] sm:$0xff] %v1752_v22  ;;  %v1758_v23 = vpack.c.bf16 %v1752_v22, %v1752_v22 }
 0x442   : > { %1984 = vmatmul.mubr.bf16.vlgmr.msra.gmra.mxu0 %v1758_v23  ;;  %2025 = vmatmul.mubr.bf16.vlgmr.msra.gmra.mxu1 %v1758_v23 }
 0x443   : > { %2260 = vmatpush1.bf16.msra.mxu0 %v4364_v44  ;;  %2301 = vmatpush1.bf16.msra.mxu1 %v4366_v27 }
 0x444   : > { %2261 = vmatprep.subr.bf16.mxu0 %v4372_v56  ;;  %2302 = vmatprep.subr.bf16.mxu1 %v4374_v55 }
 0x445   : > { %2291 = vmatprep.mubr.bf16.mxu0 %v4699_v58  ;;  %2332 = vmatprep.mubr.bf16.mxu1 %v4699_v58 }
 0x447   : > { %2262 = vmatpush1.bf16.msra.mxu0 %v4376_v52  ;;  %2303 = vmatpush1.bf16.msra.mxu1 %v4378_v51 }
 0x448   : > { %2263 = vmatprep.subr.bf16.mxu0 %v4384_v54  ;;  %2304 = vmatprep.subr.bf16.mxu1 %v4386_v17 }
 0x44b   : > { %2264 = vmatpush1.bf16.msra.mxu0 %v4388_v10  ;;  %2305 = vmatpush1.bf16.msra.mxu1 %v4390_v4 }
 0x44c   : > { %2265 = vmatprep.subr.bf16.mxu0 %v4396_v12  ;;  %2306 = vmatprep.subr.bf16.mxu1 %v4398_v59 }
 0x44f   : > { %2266 = vmatpush1.bf16.msra.mxu0 %v4400_v3  ;;  %2307 = vmatpush1.bf16.msra.mxu1 %v4402_v6 }
 0x450   : > { %2267 = vmatprep.subr.bf16.mxu0 %v4406_v60  ;;  %2308 = vmatprep.subr.bf16.mxu1 %v4408_v18 }
 0x453   : > { %2268 = vmatpush1.bf16.msra.mxu0 %v4412_v53  ;;  %2309 = vmatpush1.bf16.msra.mxu1 %v4414_v1 }
 0x454   : > { %2269 = vmatprep.subr.bf16.mxu0 %v4418_v61  ;;  %2310 = vmatprep.subr.bf16.mxu1 %v4420_v57 }
 0x457   : > { %2270 = vmatpush1.bf16.msra.mxu0 %v4424_v2  ;;  %2311 = vmatpush1.bf16.msra.mxu1 %v4426_v7 }
 0x458   : > { %2271 = vmatprep.subr.bf16.mxu0 %v4430_v0  ;;  %2312 = vmatprep.subr.bf16.mxu1 %v4432_v20 }
 0x45b   : > { %2272 = vmatpush1.bf16.msra.mxu0 %v4436_v8  ;;  %2313 = vmatpush1.bf16.msra.mxu1 %v4438_v62 }
 0x45c   : > { %2273 = vmatprep.subr.bf16.mxu0 %v4442_v5  ;;  %2314 = vmatprep.subr.bf16.mxu1 %v4444_v9 }
 0x45f   : > { %2274 = vmatpush1.bf16.msra.mxu0 %v4448_v11  ;;  %2315 = vmatpush1.bf16.msra.mxu1 %v4450_v13 }
 0x460   : > { %2567 = vmatprep.subr.bf16.mxu0 %v4360_v49  ;;  %2608 = vmatprep.subr.bf16.mxu1 %v4362_v63 }
 0x502   : > { %v1985_v47 = vpop.f32.mrf.mxu0  ;;  %v2026_v24 = vpop.f32.mrf.mxu1 }
 0x503   : > { %v2033_v26 = vadd.f32 %v1985_v47, %v4705_v25  ;;  %v2035_v43 = vadd.f32 %v2026_v24, %v4707_v42 }
 0x504   : > { %v1987_v29 = vpop.f32.mrf.mxu0  ;;  %v2028_v30 = vpop.f32.mrf.mxu1 }
 0x505   : > { %v3319_v31 = vmul.f32 -1.442695, %v2033_v26  ;;  %v2034_v34 = vadd.f32 %v1987_v29, %v4706_v33  ;;  %v3321_v45 = vmul.f32 -1.442695, %v2035_v43  ;;  %v2036_v50 = vadd.f32 %v2028_v30, %v4708_v48 }
 0x506   : > { %v1989_v35 = vpop.f32.mrf.mxu0  ;;  %v2030_v36 = vpop.f32.mrf.mxu1 }
 0x507   : > { %3674 = vpow2.f32 %v3319_v31  ;;  %v3320_v37 = vmul.f32 -1.442695, %v2034_v34  ;;  %v4709_v34 = vld [vmem:[#allocation24_spill] sm:$0xff] }
 0x508   : > { %v1990_v38 = vpop.f32.mrf.mxu0  ;;  %v2031_v41 = vpop.f32.mrf.mxu1 }
 0x509   : > { %3676 = vpow2.f32 %v3320_v37  ;;  %v4710_v41 = vld [vmem:[#allocation26_spill] sm:$0xff] }
 0x50a   : > { %3678 = vpow2.f32 %v3321_v45 }
 0x514   : > { %v3675_v46 = vpop.eup %3674 }
 0x515   : > { %v2046_v32 = vadd.f32 1.0, %v3675_v46 }
 0x516   : > { %v3677_v39 = vpop.eup %3676 }
 0x517   : > { %3680 = vrcp.f32 %v2046_v32  ;;  %v2047_v14 = vadd.f32 1.0, %v3677_v39  ;;  %v3679_v15 = vpop.eup %3678  ;;  %v4711_v32 = vld [vmem:[#allocation25_spill] sm:$0xff] }
 0x518   : > { %3682 = vtanh.f32 %v2036_v50  ;;  %v2048_v23 = vadd.f32 1.0, %v3679_v15 }
 0x519   : > { %3684 = vrcp.f32 %v2047_v14  ;;  %v4712_v14 = vld [vmem:[#allocation27_spill] sm:$0xff] }
 0x51a   : > { %3686 = vrcp.f32 %v2048_v23 }
 0x524   : > { %v3681_v19 = vpop.eup %3680 }
 0x525   : > { %v3683_v21 = vpop.eup %3682  ;;  %v2056_v47 = vmul.f32 %v3681_v19, %v4463_v16 }
 0x526   : > { %v3685_v22 = vpop.eup %3684 }
 0x527   : > { %v2057_v24 = vmul.f32 %v3685_v22, %v3683_v21  ;;  %v3687_v26 = vpop.eup %3686 }
 0x529   : > { %v4506_v25 = vadd.f32 %v2057_v24, %v2056_v47 }
 0x52b   : > { %3688 = vtanh.f32 %v4506_v25 }
 0x538   : > { %v3689_v29 = vpop.eup %3688 }
 0x539   : > { %v2060_v30 = vmul.f32 %v3689_v29, %v3687_v26 }
 0x53b   : > { %2061 = vst [vmem:[%s4005_s9 + $0x20] sm:$0xff] %v2060_v30  ;;  %v2066_v31 = vpack.c.bf16 %v2060_v30, %v2060_v30 }
 0x53d   : > { %2292 = vmatmul.mubr.bf16.vlgmr.msra.gmra.mxu0 %v2066_v31  ;;  %2333 = vmatmul.mubr.bf16.vlgmr.msra.gmra.mxu1 %v2066_v31 }
 0x53e   : > { %2568 = vmatpush1.bf16.msra.mxu0 %v4364_v44  ;;  %2609 = vmatpush1.bf16.msra.mxu1 %v4366_v27 }
 0x53f   : > { %2569 = vmatprep.subr.bf16.mxu0 %v4372_v56  ;;  %2610 = vmatprep.subr.bf16.mxu1 %v4374_v55 }
 0x540   : > { %2599 = vmatprep.mubr.bf16.mxu0 %v4699_v58  ;;  %2640 = vmatprep.mubr.bf16.mxu1 %v4699_v58 }
 0x542   : > { %2570 = vmatpush1.bf16.msra.mxu0 %v4376_v52  ;;  %2611 = vmatpush1.bf16.msra.mxu1 %v4378_v51 }
 0x543   : > { %2571 = vmatprep.subr.bf16.mxu0 %v4384_v54  ;;  %2612 = vmatprep.subr.bf16.mxu1 %v4386_v17 }
 0x546   : > { %2572 = vmatpush1.bf16.msra.mxu0 %v4388_v10  ;;  %2613 = vmatpush1.bf16.msra.mxu1 %v4390_v4 }
 0x547   : > { %2573 = vmatprep.subr.bf16.mxu0 %v4396_v12  ;;  %2614 = vmatprep.subr.bf16.mxu1 %v4398_v59 }
 0x54a   : > { %2574 = vmatpush1.bf16.msra.mxu0 %v4400_v3  ;;  %2615 = vmatpush1.bf16.msra.mxu1 %v4402_v6 }
 0x54b   : > { %2575 = vmatprep.subr.bf16.mxu0 %v4406_v60  ;;  %2616 = vmatprep.subr.bf16.mxu1 %v4408_v18 }
 0x54e   : > { %2576 = vmatpush1.bf16.msra.mxu0 %v4412_v53  ;;  %2617 = vmatpush1.bf16.msra.mxu1 %v4414_v1 }
 0x54f   : > { %2577 = vmatprep.subr.bf16.mxu0 %v4418_v61  ;;  %2618 = vmatprep.subr.bf16.mxu1 %v4420_v57 }
 0x552   : > { %2578 = vmatpush1.bf16.msra.mxu0 %v4424_v2  ;;  %2619 = vmatpush1.bf16.msra.mxu1 %v4426_v7 }
 0x553   : > { %2579 = vmatprep.subr.bf16.mxu0 %v4430_v0  ;;  %2620 = vmatprep.subr.bf16.mxu1 %v4432_v20 }
 0x556   : > { %2580 = vmatpush1.bf16.msra.mxu0 %v4436_v8  ;;  %2621 = vmatpush1.bf16.msra.mxu1 %v4438_v62 }
 0x557   : > { %2581 = vmatprep.subr.bf16.mxu0 %v4442_v5  ;;  %2622 = vmatprep.subr.bf16.mxu1 %v4444_v9 }
 0x55a   : > { %2582 = vmatpush1.bf16.msra.mxu0 %v4448_v11  ;;  %2623 = vmatpush1.bf16.msra.mxu1 %v4450_v13 }
 0x55b   : > { %2875 = vmatprep.subr.bf16.mxu0 %v4360_v49  ;;  %2916 = vmatprep.subr.bf16.mxu1 %v4362_v63 }
 0x5fd   : > { %v2293_v16 = vpop.f32.mrf.mxu0  ;;  %v2334_v33 = vpop.f32.mrf.mxu1 }
 0x5fe   : > { %v2341_v35 = vadd.f32 %v2293_v16, %v4709_v34  ;;  %v2343_v49 = vadd.f32 %v2334_v33, %v4711_v32 }
 0x5ff   : > { %v2295_v36 = vpop.f32.mrf.mxu0  ;;  %v2336_v37 = vpop.f32.mrf.mxu1 }
 0x600   : > { %v3354_v38 = vmul.f32 -1.442695, %v2341_v35  ;;  %v2342_v42 = vadd.f32 %v2295_v36, %v4710_v41  ;;  %v3356_v39 = vmul.f32 -1.442695, %v2343_v49  ;;  %v2344_v15 = vadd.f32 %v2336_v37, %v4712_v14 }
 0x601   : > { %v2297_v43 = vpop.f32.mrf.mxu0  ;;  %v2338_v45 = vpop.f32.mrf.mxu1 }
 0x602   : > { %3690 = vpow2.f32 %v3354_v38  ;;  %v3355_v46 = vmul.f32 -1.442695, %v2342_v42  ;;  %v4717_v45 = vld [vmem:[#allocation32_spill] sm:$0xff] }
 0x603   : > { %v2298_v48 = vpop.f32.mrf.mxu0  ;;  %v2339_v50 = vpop.f32.mrf.mxu1 }
 0x604   : > { %3692 = vpow2.f32 %v3355_v46 }
 0x605   : > { %3694 = vpow2.f32 %v3356_v39 }
 0x60f   : > { %v3691_v63 = vpop.eup %3690 }
 0x610   : > { %v2354_v19 = vadd.f32 1.0, %v3691_v63 }
 0x611   : > { %v3693_v21 = vpop.eup %3692 }
 0x612   : > { %3696 = vrcp.f32 %v2354_v19  ;;  %v2355_v22 = vadd.f32 1.0, %v3693_v21  ;;  %v3695_v23 = vpop.eup %3694  ;;  %v4718_v21 = vld [vmem:[#allocation33_spill] sm:$0xff] }
 0x613   : > { %3698 = vtanh.f32 %v2344_v15  ;;  %v2356_v29 = vadd.f32 1.0, %v3695_v23 }
 0x614   : > { %3700 = vrcp.f32 %v2355_v22 }
 0x615   : > { %3702 = vrcp.f32 %v2356_v29 }
 0x61f   : > { %v3697_v47 = vpop.eup %3696 }
 0x620   : > { %v3699_v24 = vpop.eup %3698  ;;  %v2364_v30 = vmul.f32 %v3697_v47, %v4506_v25 }
 0x621   : > { %v3701_v26 = vpop.eup %3700 }
 0x622   : > { %v2365_v31 = vmul.f32 %v3701_v26, %v3699_v24  ;;  %v3703_v33 = vpop.eup %3702 }
 0x624   : > { %v4549_v16 = vadd.f32 %v2365_v31, %v2364_v30 }
 0x626   : > { %3704 = vtanh.f32 %v4549_v16 }
 0x633   : > { %v3705_v34 = vpop.eup %3704 }
 0x634   : > { %v2368_v35 = vmul.f32 %v3705_v34, %v3703_v33 }
 0x636   : > { %2369 = vst [vmem:[%s4005_s9 + $0x28] sm:$0xff] %v2368_v35  ;;  %v2374_v36 = vpack.c.bf16 %v2368_v35, %v2368_v35 }
 0x638   : > { %2600 = vmatmul.mubr.bf16.vlgmr.msra.gmra.mxu0 %v2374_v36  ;;  %2641 = vmatmul.mubr.bf16.vlgmr.msra.gmra.mxu1 %v2374_v36 }
 0x639   : > { %2876 = vmatpush1.bf16.msra.mxu0 %v4364_v44  ;;  %2917 = vmatpush1.bf16.msra.mxu1 %v4366_v27  ;;  %v4713_v27 = vld [vmem:[#allocation28_spill] sm:$0xff] }
 0x63a   : > { %2877 = vmatprep.subr.bf16.mxu0 %v4372_v56  ;;  %2918 = vmatprep.subr.bf16.mxu1 %v4374_v55 }
 0x63b   : > { %2907 = vmatprep.mubr.bf16.mxu0 %v4699_v58  ;;  %2948 = vmatprep.mubr.bf16.mxu1 %v4699_v58 }
 0x63d   : > { %2878 = vmatpush1.bf16.msra.mxu0 %v4376_v52  ;;  %2919 = vmatpush1.bf16.msra.mxu1 %v4378_v51 }
 0x63e   : > { %2879 = vmatprep.subr.bf16.mxu0 %v4384_v54  ;;  %2920 = vmatprep.subr.bf16.mxu1 %v4386_v17  ;;  %v4714_v54 = vld [vmem:[#allocation30_spill] sm:$0xff] }
 0x641   : > { %2880 = vmatpush1.bf16.msra.mxu0 %v4388_v10  ;;  %2921 = vmatpush1.bf16.msra.mxu1 %v4390_v4 }
 0x642   : > { %2881 = vmatprep.subr.bf16.mxu0 %v4396_v12  ;;  %2922 = vmatprep.subr.bf16.mxu1 %v4398_v59 }
 0x645   : > { %2882 = vmatpush1.bf16.msra.mxu0 %v4400_v3  ;;  %2923 = vmatpush1.bf16.msra.mxu1 %v4402_v6  ;;  %v4715_v6 = vld [vmem:[#allocation29_spill] sm:$0xff] }
 0x646   : > { %2883 = vmatprep.subr.bf16.mxu0 %v4406_v60  ;;  %2924 = vmatprep.subr.bf16.mxu1 %v4408_v18 }
 0x649   : > { %2884 = vmatpush1.bf16.msra.mxu0 %v4412_v53  ;;  %2925 = vmatpush1.bf16.msra.mxu1 %v4414_v1  ;;  %v4716_v1 = vld [vmem:[#allocation31_spill] sm:$0xff] }
 0x64a   : > { %2885 = vmatprep.subr.bf16.mxu0 %v4418_v61  ;;  %2926 = vmatprep.subr.bf16.mxu1 %v4420_v57 }
 0x64d   : > { %2886 = vmatpush1.bf16.msra.mxu0 %v4424_v2  ;;  %2927 = vmatpush1.bf16.msra.mxu1 %v4426_v7 }
 0x64e   : > { %2887 = vmatprep.subr.bf16.mxu0 %v4430_v0  ;;  %2928 = vmatprep.subr.bf16.mxu1 %v4432_v20 }
 0x651   : > { %2888 = vmatpush1.bf16.msra.mxu0 %v4436_v8  ;;  %2929 = vmatpush1.bf16.msra.mxu1 %v4438_v62 }
 0x652   : > { %2889 = vmatprep.subr.bf16.mxu0 %v4442_v5  ;;  %2930 = vmatprep.subr.bf16.mxu1 %v4444_v9 }
 0x655   : > { %2890 = vmatpush1.bf16.msra.mxu0 %v4448_v11  ;;  %2931 = vmatpush1.bf16.msra.mxu1 %v4450_v13 }
 0x6f8   : > { %v2601_v58 = vpop.f32.mrf.mxu0  ;;  %v2642_v44 = vpop.f32.mrf.mxu1 }
 0x6f9   : > { %v2649_v56 = vadd.f32 %v2601_v58, %v4713_v27  ;;  %v2651_v60 = vadd.f32 %v2642_v44, %v4715_v6 }
 0x6fa   : > { %v2603_v55 = vpop.f32.mrf.mxu0  ;;  %v2644_v52 = vpop.f32.mrf.mxu1 }
 0x6fb   : > { %v3389_v51 = vmul.f32 -1.442695, %v2649_v56  ;;  %v2650_v17 = vadd.f32 %v2603_v55, %v4714_v54  ;;  %v3391_v18 = vmul.f32 -1.442695, %v2651_v60  ;;  %v2652_v61 = vadd.f32 %v2644_v52, %v4716_v1 }
 0x6fc   : > { %v2605_v10 = vpop.f32.mrf.mxu0  ;;  %v2646_v4 = vpop.f32.mrf.mxu1 }
 0x6fd   : > { %3706 = vpow2.f32 %v3389_v51  ;;  %v3390_v12 = vmul.f32 -1.442695, %v2650_v17 }
 0x6fe   : > { %v2606_v59 = vpop.f32.mrf.mxu0  ;;  %v2647_v3 = vpop.f32.mrf.mxu1 }
 0x6ff   : > { %3708 = vpow2.f32 %v3390_v12 }
 0x700   : > { %3710 = vpow2.f32 %v3391_v18 }
 0x70a   : > { %v3707_v53 = vpop.eup %3706 }
 0x70b   : > { %v2662_v57 = vadd.f32 1.0, %v3707_v53 }
 0x70c   : > { %v3709_v2 = vpop.eup %3708 }
 0x70d   : > { %3712 = vrcp.f32 %v2662_v57  ;;  %v2663_v7 = vadd.f32 1.0, %v3709_v2  ;;  %v3711_v0 = vpop.eup %3710 }
 0x70e   : > { %3714 = vtanh.f32 %v2652_v61  ;;  %v2664_v5 = vadd.f32 1.0, %v3711_v0 }
 0x70f   : > { %3716 = vrcp.f32 %v2663_v7 }
 0x710   : > { %3718 = vrcp.f32 %v2664_v5 }
 0x71a   : > { %v3713_v20 = vpop.eup %3712 }
 0x71b   : > { %v3715_v8 = vpop.eup %3714  ;;  %v2672_v9 = vmul.f32 %v3713_v20, %v4549_v16 }
 0x71c   : > { %v3717_v62 = vpop.eup %3716 }
 0x71d   : > { %v2673_v11 = vmul.f32 %v3717_v62, %v3715_v8  ;;  %v3719_v25 = vpop.eup %3718 }
 0x71f   : > { %v2674_v13 = vadd.f32 %v2673_v11, %v2672_v9 }
 0x721   : > { %3720 = vtanh.f32 %v2674_v13 }
 0x72e   : > { %v3721_v37 = vpop.eup %3720 }
 0x72f   : > { %v2676_v38 = vmul.f32 %v3721_v37, %v3719_v25 }
 0x731   : > { %2677 = vst [vmem:[%s4005_s9 + $0x30] sm:$0xff] %v2676_v38  ;;  %v2682_v41 = vpack.c.bf16 %v2676_v38, %v2676_v38 }
 0x733   : > { %2908 = vmatmul.mubr.bf16.vlgmr.msra.gmra.mxu0 %v2682_v41  ;;  %2949 = vmatmul.mubr.bf16.vlgmr.msra.gmra.mxu1 %v2682_v41 }
 0x7f3   : > { %v2909_v42 = vpop.f32.mrf.mxu0  ;;  %v2950_v43 = vpop.f32.mrf.mxu1 }
 0x7f4   : > { %v2957_v46 = vadd.f32 %v2909_v42, %v4717_v45  ;;  %v2959_v22 = vadd.f32 %v2950_v43, %v4718_v21 }
 0x7f5   : > { %v2911_v48 = vpop.f32.mrf.mxu0  ;;  %v2952_v50 = vpop.f32.mrf.mxu1 }
 0x7f6   : > { %v3424_v32 = vmul.f32 -1.442695, %v2957_v46  ;;  %v2958_v49 = vadd.f32 %v2911_v48, %v4260_v28  ;;  %v3426_v23 = vmul.f32 -1.442695, %v2959_v22  ;;  %v2960_v24 = vadd.f32 %v2952_v50, %v4263_v40 }
 0x7f7   : > { %v2913_v39 = vpop.f32.mrf.mxu0  ;;  %v2954_v63 = vpop.f32.mrf.mxu1 }
 0x7f8   : > { %3722 = vpow2.f32 %v3424_v32  ;;  %v3425_v14 = vmul.f32 -1.442695, %v2958_v49 }
 0x7f9   : > { %v2914_v15 = vpop.f32.mrf.mxu0  ;;  %v2955_v19 = vpop.f32.mrf.mxu1 }
 0x7fa   : > { %3724 = vpow2.f32 %v3425_v14 }
 0x7fb   : > { %3726 = vpow2.f32 %v3426_v23 }
 0x805   : > { %v3723_v47 = vpop.eup %3722 }
 0x806   : > { %v2970_v26 = vadd.f32 1.0, %v3723_v47 }
 0x807   : > { %v3725_v29 = vpop.eup %3724 }
 0x808   : > { %3728 = vrcp.f32 %v2970_v26  ;;  %v2971_v30 = vadd.f32 1.0, %v3725_v29  ;;  %v3727_v28 = vpop.eup %3726 }
 0x809   : > { %3730 = vtanh.f32 %v2960_v24  ;;  %v2972_v34 = vadd.f32 1.0, %v3727_v28 }
 0x80a   : > { %3732 = vrcp.f32 %v2971_v30 }
 0x80b   : > { %3734 = vrcp.f32 %v2972_v34 }
 0x815   : > { %v3729_v31 = vpop.eup %3728 }
 0x816   : > { %v3731_v16 = vpop.eup %3730  ;;  %v2980_v35 = vmul.f32 %v3729_v31, %v2674_v13 }
 0x817   : > { %v3733_v33 = vpop.eup %3732 }
 0x818   : > { %v2981_v36 = vmul.f32 %v3733_v33, %v3731_v16  ;;  %v3735_v40 = vpop.eup %3734 }
 0x81a   : > { %v2982_v58 = vadd.f32 %v2981_v36, %v2980_v35 }
 0x81c   : > { %3736 = vtanh.f32 %v2982_v58  ;;  %2987 = vst [vmem:[#allocation4] sm:$0xff] %v2982_v58 }
 0x828   : > { %2991 = sbr.rel (%p3427_p8) target bundleno = 2094 (0x82e), region = 48 }
 0x829   : > { %v3737_v44 = vpop.eup %3736 }
 0x82a   : > { %v2984_v27 = vmul.f32 %v3737_v44, %v3735_v40 }
 0x82c   : > { %2985 = vst [vmem:[%s4005_s9 + $0x38] sm:$0xff] %v2984_v27  ;;  %2986 = vst [vmem:[#allocation3] sm:$0xff] %v2984_v27 }
 0x82d   : > { %2992 = vst [vmem:[#allocation9] sm:$0xff] %v2984_v27  ;;  %2993 = vst [vmem:[#allocation11] sm:$0xff] %v2982_v58 }
 0x82e PF: > { %s3887_s26 = smov [#allocation9]   ;;  %s3437_s29 = sshll.u32 %s3948_s25, 10 }
 0x82f   : > { %s3022_s28 = sshll.u32 %s3887_s26, 4  ;;  %s4601_s12 = scalar_lea.hbm %s4670_s4, %s3437_s29  ;;  %s3023_s28 = int_to_ptr.vmem [resolvable:$true] %s3022_s28 }
 0x830   : > { %s3764_s13 = scalar_lea.vmem %s3023_s28, 128  ;;  %p4719_p10 = scmp.eq.s32.totalorder %s3948_s25, 1 }
 0x831   : > { %p3765_p9 = scmp.ne.s32.totalorder %s3023_s28, %s3764_s13  ;;  %p3771_p13 = scmp.lt.s32.totalorder %s3023_s28, %s3023_s28 }
 0x832   : > { %p3772_p0 = scmp.lt.s32.totalorder %s3764_s13, %s3764_s13 }
 0x833   : > { %p3766_p11 = pnand %p3765_p9, %p4719_p10 }
 0x834   : > { %p3773_p1 = por %p3772_p0, %p3771_p13 }
 0x835   : > { %p3767_p12 = pneg %p3766_p11 }
 0x837   : > { %p3774_p3 = pnand %p3773_p1, %p3767_p12 }
 0x839   : > { %3777 = shalt.err (!%p3774_p3)
}
 0x83a   : > { %p4720_p4 = pmov %p4719_p10  ;;  %s3008_s16 = sshll.u32 %s4005_s9, 4  ;;  %s4611_s16 = int_to_ptr.vmem [resolvable:$true] %s3008_s16 }
 0x83b   : > { %s4615_s18 = scalar_lea.sflag [#allocation7], %s250_s17  ;;  %s3788_s19 = scalar_lea.vmem %s4611_s16, 1024 }
 0x83c   : > { %3444 = dma.vmem_to_hbm [thread:$0]  (%p4720_p4), %s3023_s28, 128, %s4671_s5, [#allocation10]  }
 0x83d   : > { %p3789_p7 = scmp.ne.s32.totalorder %s4611_s16, %s3788_s19  ;;  %s3888_s20 = smov [#allocation8]  }
 0x83e   : > { %s3792_s26 = sshll.u32 %s3888_s20, 4  ;;  %s3793_s26 = int_to_ptr.vmem [resolvable:$false] %s3792_s26 }
 0x83f   : > { %p3790_p2 = pnand %p3789_p7, %p3967_p5  ;;  %s3794_s29 = scalar_lea.vmem %s3793_s26, 2048 }
 0x840   : > { %p3795_p8 = scmp.lt.s32.totalorder %s4611_s16, %s3793_s26  ;;  %p3796_p9 = scmp.lt.s32.totalorder %s3794_s29, %s3788_s19 }
 0x841   : > { %p3791_p6 = pneg %p3790_p2 }
 0x842   : > { %p3797_p10 = por %p3796_p9, %p3795_p8 }
 0x844   : > { %p3798_p11 = pnand %p3797_p10, %p3791_p6 }
 0x846   : > { %3801 = shalt.err (!%p3798_p11)
}
 0x847   : > { %s3802_s17 = scalar_lea.hbm %s4601_s12, 1024  ;;  %s3806_s10 = scalar_lea.hbm %s4670_s4, 2048 }
 0x848   : > { %p3803_p12 = scmp.ne.s32.totalorder %s4601_s12, %s3802_s17  ;;  %p3807_p1 = scmp.lt.s32.totalorder %s4601_s12, %s4670_s4 }
 0x849   : > { %p3808_p3 = scmp.lt.s32.totalorder %s3806_s10, %s3802_s17 }
 0x84a   : > { %p3804_p13 = pnand %p3803_p12, %p3967_p5 }
 0x84b   : > { %p3809_p4 = por %p3808_p3, %p3807_p1 }
 0x84c   : > { %p3805_p0 = pneg %p3804_p13 }
 0x84e   : > { %p3810_p7 = pnand %p3809_p4, %p3805_p0 }
 0x850   : > { %3813 = shalt.err (!%p3810_p7)
}
 0x851   : > { %s3889_s14 = smov 128   ;;  %s3890_s15 = smov 8  }
 0x852   : > { %3442 = dma.vmem_to_hbm [thread:$0]  (%p3967_p5), %s4611_s16, 1024, %s4601_s12, %s4615_s18, %s3889_s14, %s3889_s14, %s3890_s15  }
 0x853   : > { %s3891_s19 = smov [#allocation11]   ;;  %p4721_p6 = scmp.eq.s32.totalorder %s3948_s25, 1 }
 0x854   : > { %s3033_s20 = sshll.u32 %s3891_s19, 4  ;;  %s3034_s20 = int_to_ptr.vmem [resolvable:$true] %s3033_s20 }
 0x855   : > { %s3814_s26 = scalar_lea.vmem %s3034_s20, 128  ;;  %p3821_p10 = scmp.lt.s32.totalorder %s3034_s20, %s3034_s20 }
 0x856   : > { %p3815_p2 = scmp.ne.s32.totalorder %s3034_s20, %s3814_s26  ;;  %p3822_p11 = scmp.lt.s32.totalorder %s3814_s26, %s3814_s26 }
 0x858   : > { %p3816_p8 = pnand %p3815_p2, %p4721_p6  ;;  %p3823_p12 = por %p3822_p11, %p3821_p10 }
 0x85a   : > { %p3817_p9 = pneg %p3816_p8 }
 0x85c   : > { %p3824_p13 = pnand %p3823_p12, %p3817_p9 }
 0x85e   : > { %3827 = shalt.err (!%p3824_p13)
}
 0x85f   : > { %p4722_p0 = pmov %p4721_p6 }
 0x861   : > { %3446 = dma.vmem_to_hbm [thread:$0]  (%p4722_p0), %s3034_s20, 128, %s4672_s6, [#allocation10]  }
 0x862   : > { %p4723_p5 = pmov %p4722_p0 }
 0x863   : > { %p4724_p1 = pmov %p4722_p0 }
 0x864   : > { %3859 = dma.done.wait (%p4723_p5), [#allocation10], 256  }
 0x865   : > { %3861 = vsyncadd (%p4724_p1), [#allocation10], 4294967040 }
 0x866 PF: > { %p3466_p3 = scmp.ge.s32.totalorder %s3880_s24, 2  ;;  %s3053_s7 = sand.u32 1, %s3868_s21  }
 0x867   : > { %p4725_p4 = scmp.ne.s32.totalorder %s4677_s8, 0  ;;  %s3054_s12 = scalar_lea.sflag [#allocation7], %s3053_s7 }
 0x869   : > { %p3457_p7 = pnand %p3466_p3, %p4725_p4 }
 0x86b   : > { %p3458_p2 = pneg %p3457_p7 }
 0x86d   : > { %3863 = dma.done.wait (%p3458_p2), %s3054_s12, 1024  }
 0x86e   : > { %3865 = vsyncadd (%p3458_p2), %s3054_s12, 4294966272  ;;  %p19_p6 = scmp.ge.s32.totalorder %s3952_s27, 4   ;;  %s4726_s21 = smov %s3872_s22 }
 0x86f   : > { %s4727_s22 = smov %s3876_s23  ;;  %s4728_s23 = smov %s3963_s30 }
 0x870   : > { %s4729_s24 = smov %s3952_s27  ;;  %21 = sbr.rel (!%p19_p6) target bundleno = 5 (0x5), region = 100 }
 0x875   :  { %3059 = vsyncpa [#allocation6], 1 }
 0x876   :  { %3061 = vsyncpa [#allocation6 + $0x1], 1 }
 0x877   :  { %3062 = vsyncpa [#allocation7], 1 }
 0x878   :  { %3064 = vsyncpa [#allocation7 + $0x1], 1 }
 0x879   :  { %3065 = vsyncpa [#allocation10], 1 }

</bundles_post_ra>
